<compile_context>
chip_gen: v6e
topology: v6e:2x2x1
jax: 0.10.0
libtpu: 0.0.40
codegen_flags: <defaults>
</compile_context>

<pallas_src>
import jax
import jax.numpy as jnp
from jax.experimental import pallas as pl
from jax.experimental.pallas import tpu as pltpu


def _round_up(x, m):
    return ((x + m - 1) // m) * m


# --------------------------- fused forward kernel ---------------------------
def _make_kernel(wv, tm, n_valid):
    """wv: per-view padded width (multiple of 128); tm: row tile; n_valid: real rows."""

    def kernel(x_ref, a_ref, w_ref, b_ref, v_ref, c_ref, o_ref,
               xw_ref, h_ref, acc_ref):
        l = pl.program_id(0)           # layer (arbitrary / sequential)
        i = pl.program_id(1)           # row tile (arbitrary / sequential)
        n_layers = pl.num_programs(0)
        n_tiles = pl.num_programs(1)

        # ---- once per layer: packed X@W for ALL rows (both views, shared weight) ----
        @pl.when(i == 0)
        def _():
            w = w_ref[0]                                    # (wv, wv) bf16

            def write_xw(src_ref):                          # src_ref: (Np, 2*wv) bf16
                xw1 = jnp.dot(src_ref[:, 0:wv], w,
                              preferred_element_type=jnp.float32)
                xw2 = jnp.dot(src_ref[:, wv:2 * wv], w,
                              preferred_element_type=jnp.float32)
                xw_ref[:, 0:wv] = xw1.astype(jnp.bfloat16)
                xw_ref[:, wv:2 * wv] = xw2.astype(jnp.bfloat16)

            @pl.when(l == 0)
            def _():
                write_xw(x_ref)

            @pl.when(l > 0)
            def _():
                write_xw(h_ref)

        # ---- per row tile: ONE wide A matmul covering both views ----
        z = jnp.dot(a_ref[...], xw_ref[...], preferred_element_type=jnp.float32)
        hb = jnp.maximum(z + b_ref[0], 0.0).astype(jnp.bfloat16)   # (tm, 2*wv)
        row0 = pl.multiple_of(i * tm, tm)
        h_ref[pl.ds(row0, tm), :] = hb

        # ---- last layer: projection matvec + masked BCE, accumulated over tiles ----
        @pl.when(l == n_layers - 1)
        def _():
            @pl.when(i == 0)
            def _():
                acc_ref[0] = jnp.float32(0.0)

            # sum(proj(h), -1) == h @ v + c  (v packs both views as a [2*wv, 2] matrix)
            scores = jnp.dot(hb, v_ref[...], preferred_element_type=jnp.float32)
            scores = scores + c_ref[0, 0]                   # (tm, 2)
            sc1 = scores[:, 0:1]                            # view 1, label = 1
            sc2 = scores[:, 1:2]                            # view 2, label = 0
            l1 = jnp.maximum(sc1, 0.0) - sc1 + jnp.log1p(jnp.exp(-jnp.abs(sc1)))
            l2 = jnp.maximum(sc2, 0.0) + jnp.log1p(jnp.exp(-jnp.abs(sc2)))
            row = row0 + jax.lax.broadcasted_iota(jnp.int32, (tm, 1), 0)
            valid = (row < n_valid).astype(jnp.float32)     # mask padded rows
            acc_ref[0] += jnp.sum((l1 + l2) * valid)

            @pl.when(i == n_tiles - 1)
            def _():
                o_ref[0, 0] = acc_ref[0] / (2.0 * n_valid)

    return kernel


# --------------------------------- wrapper ----------------------------------
def model_ggd_forward(a_hat, features, corrupt_feat, drop_mask,
                      enc_ws, enc_bs, mlp_ws, mlp_bs, *, tile_rows=128):
    n, in_dim = features.shape
    hidden = enc_ws[-1].shape[1]
    num_layers = len(enc_ws)
    assert num_layers >= 1

    # Per-view padded width: lane-dense multiple of 128 covering input & hidden dims.
    wv = max(_round_up(in_dim, 128), _round_up(hidden, 128))
    tm = min(tile_rows, _round_up(n, 16))      # row tile, bf16-sublane aligned
    n_pad = _round_up(n, tm)
    n_tiles = n_pad // tm

    # (1) Fold feature-dropout column mask into the first-layer weight.
    #     (assumes no inverted-dropout 1/(1-p) rescale; include it here if present)
    w0 = enc_ws[0] * drop_mask.reshape(-1, 1)
    ws = [w0] + list(enc_ws[1:])

    # (2) Uniformly pad + stack per-layer weights/biases (weights shared between views).
    w_stack = jnp.zeros((num_layers, wv, wv), jnp.float32)
    b_stack = jnp.zeros((num_layers, 1, 2 * wv), jnp.float32)
    for l, (w, b) in enumerate(zip(ws, enc_bs)):
        di, do = w.shape
        bv = b.reshape(-1)
        w_stack = w_stack.at[l, :di, :do].set(w)
        b_stack = b_stack.at[l, 0, :do].set(bv)
        b_stack = b_stack.at[l, 0, wv:wv + do].set(bv)
    w_stack = w_stack.astype(jnp.bfloat16)

    # (3) Collapse the activation-free projection MLP + row-sum into  h @ v + c.
    # TODO(synk): only valid for a linear projection head (no PReLU etc.).
    v = jnp.ones((hidden, 1), jnp.float32)
    c = jnp.zeros((), jnp.float32)
    for w, b in reversed(list(zip(mlp_ws, mlp_bs))):
        c = c + (b @ v)[0, 0]
        v = w @ v
    v_mat = jnp.zeros((2 * wv, 2), jnp.float32)
    v_mat = v_mat.at[:hidden, 0].set(v[:, 0])          # selects view-1 half
    v_mat = v_mat.at[wv:wv + hidden, 1].set(v[:, 0])   # selects view-2 half
    v_mat = v_mat.astype(jnp.bfloat16)
    c_arr = jnp.full((1, 1), c, jnp.float32)

    # (4) Lane-pack both views and zero-pad rows / A_hat.
    x_both = jnp.zeros((n_pad, 2 * wv), jnp.float32)
    x_both = x_both.at[:n, :in_dim].set(features)
    x_both = x_both.at[:n, wv:wv + in_dim].set(corrupt_feat)
    x_both = x_both.astype(jnp.bfloat16)
    a_pad = jnp.zeros((n_pad, n_pad), jnp.float32)
    a_pad = a_pad.at[:n, :n].set(a_hat)
    a_pad = a_pad.astype(jnp.bfloat16)

    vmem = pltpu.MemorySpace.VMEM
    smem = pltpu.MemorySpace.SMEM

    in_specs = [
        pl.BlockSpec(memory_space=vmem),                        # x_both (fully resident)
        pl.BlockSpec((tm, n_pad), lambda l, i: (i, 0)),         # A row slab (streamed)
        pl.BlockSpec((1, wv, wv), lambda l, i: (l, 0, 0)),      # W_l
        pl.BlockSpec((1, 1, 2 * wv), lambda l, i: (l, 0, 0)),   # b_l (both views)
        pl.BlockSpec(memory_space=vmem),                        # projection matvec V
        pl.BlockSpec(memory_space=smem),                        # constant c
    ]

    loss = pl.pallas_call(
        _make_kernel(wv, tm, n),
        out_shape=jax.ShapeDtypeStruct((1, 1), jnp.float32),
        grid=(num_layers, n_tiles),
        in_specs=in_specs,
        out_specs=pl.BlockSpec(memory_space=smem),              # scalar loss in SMEM
        scratch_shapes=[
            pltpu.VMEM((n_pad, 2 * wv), jnp.bfloat16),          # X@W (current layer)
            pltpu.VMEM((n_pad, 2 * wv), jnp.bfloat16),          # layer activations h
            pltpu.SMEM((1,), jnp.float32),                      # loss accumulator
        ],
        compiler_params=pltpu.CompilerParams(
            dimension_semantics=("arbitrary", "arbitrary"),
            vmem_limit_bytes=64 * 1024 * 1024,
        ),
    )(x_both, a_pad, w_stack, b_stack, v_mat, c_arr)
    return loss[0, 0]


# ------------------------- pure-JAX reference (f32) -------------------------
def reference_loss(a_hat, features, corrupt_feat, drop_mask,
                   enc_ws, enc_bs, mlp_ws, mlp_bs):
    def encode(x):
        h = x * drop_mask                      # feature dropout on the input layer only
        for w, b in zip(enc_ws, enc_bs):
            h = jnp.maximum(a_hat @ (h @ w) + b, 0.0)
        return h

    def project(h):
        for w, b in zip(mlp_ws, mlp_bs):
            h = h @ w + b
        return h

    h1 = project(encode(features))
    h2 = project(encode(corrupt_feat))
    sc1 = jnp.sum(h1, axis=1)
    sc2 = jnp.sum(h2, axis=1)
    l1 = jnp.maximum(sc1, 0.0) - sc1 + jnp.log1p(jnp.exp(-jnp.abs(sc1)))
    l2 = jnp.maximum(sc2, 0.0) + jnp.log1p(jnp.exp(-jnp.abs(sc2)))
    return (jnp.sum(l1) + jnp.sum(l2)) / (2.0 * features.shape[0])


if __name__ == "__main__":
    # Small shapes consistent with the module (N not a tile multiple to exercise masking).
    N = 200
    IN_DIM = 32
    NUM_HIDDEN = 32
    NUM_LAYERS = 2
    NUM_PROJ_LAYERS = 1
    DROP_FEAT = 0.2

    key = jax.random.PRNGKey(0)
    k_adj, k_feat, k_corr, k_drop, k_w = jax.random.split(key, 5)

    # Dense symmetric graph with self-loops, symmetric normalization D^-1/2 (A+I) D^-1/2.
    adj = (jax.random.uniform(k_adj, (N, N)) < 0.2).astype(jnp.float32)
    adj = jnp.maximum(adj, adj.T)
    adj = adj + jnp.eye(N, dtype=jnp.float32)
    deg = jnp.sum(adj, axis=1)
    d_inv_sqrt = 1.0 / jnp.sqrt(deg)
    a_hat = adj * d_inv_sqrt[:, None] * d_inv_sqrt[None, :]

    features = jax.random.normal(k_feat, (N, IN_DIM), jnp.float32)
    # corrupt_feat = row-shuffled features (standard GGD corruption)
    corrupt_feat = features[jax.random.permutation(k_corr, N)]

    # aug_feature_dropout: same 20% of feature columns zeroed in both views.
    drop_num = int(IN_DIM * DROP_FEAT)
    drop_idx = jax.random.permutation(k_drop, IN_DIM)[:drop_num]
    drop_mask = jnp.ones((IN_DIM,), jnp.float32).at[drop_idx].set(0.0).reshape(1, IN_DIM)

    # Deterministic parameter init (encoder GCN stack + projection MLP).
    wkeys = jax.random.split(k_w, NUM_LAYERS + NUM_PROJ_LAYERS)
    enc_ws, enc_bs = [], []
    d_in = IN_DIM
    for li in range(NUM_LAYERS):
        enc_ws.append(jax.random.normal(wkeys[li], (d_in, NUM_HIDDEN), jnp.float32)
                      * (1.0 / jnp.sqrt(d_in)))
        enc_bs.append(jnp.zeros((1, NUM_HIDDEN), jnp.float32))
        d_in = NUM_HIDDEN
    mlp_ws, mlp_bs = [], []
    for li in range(NUM_PROJ_LAYERS):
        mlp_ws.append(jax.random.normal(wkeys[NUM_LAYERS + li],
                                        (NUM_HIDDEN, NUM_HIDDEN), jnp.float32)
                      * (1.0 / jnp.sqrt(NUM_HIDDEN)))
        mlp_bs.append(jnp.zeros((1, NUM_HIDDEN), jnp.float32))

    loss = model_ggd_forward(a_hat, features, corrupt_feat, drop_mask,
                             enc_ws, enc_bs, mlp_ws, mlp_bs)
    jax.block_until_ready(loss)

    ref = reference_loss(a_hat, features, corrupt_feat, drop_mask,
                         enc_ws, enc_bs, mlp_ws, mlp_bs)

    assert loss.shape == () and jnp.isfinite(loss)
    # bf16 matmul inputs vs f32 reference -> generous tolerance.
    assert jnp.allclose(loss, ref, rtol=0.1, atol=0.1), (float(loss), float(ref))
    print("KERNEL_OK")
</pallas_src>

<mosaic_0001>
module attributes {stable_mosaic.version = 11 : i64} {
  func.func @kernel(%arg0: i32, %arg1: i32, %arg2: memref<256x256xbf16, #tpu.memory_space<vmem>>, %arg3: memref<128x256xbf16, #tpu.memory_space<vmem>>, %arg4: memref<1x128x128xbf16, #tpu.memory_space<vmem>>, %arg5: memref<1x1x256xf32, #tpu.memory_space<vmem>>, %arg6: memref<256x2xbf16, #tpu.memory_space<vmem>>, %arg7: memref<1x1xf32, #tpu.memory_space<smem>>, %arg8: memref<1x1xf32, #tpu.memory_space<smem>>, %arg9: memref<256x256xbf16, #tpu.memory_space<vmem>>, %arg10: memref<256x256xbf16, #tpu.memory_space<vmem>>, %arg11: memref<1xf32, #tpu.memory_space<smem>>) attributes {dimension_semantics = [#tpu.dimension_semantics<arbitrary>, #tpu.dimension_semantics<arbitrary>], iteration_bounds = array<i64: 2, 2>, scalar_prefetch = 0 : i64, scratch_operands = 3 : i64, tpu.core_type = #tpu.core_type<tc>, window_params = [{pipeline_mode = #tpu.pipeline_mode<synchronous>, transform_indices = @transform_0, window_bounds = array<i64: 256, 256>}, {transform_indices = @transform_1, window_bounds = array<i64: 128, 256>}, {transform_indices = @transform_2, window_bounds = array<i64: 1, 128, 128>}, {transform_indices = @transform_3, window_bounds = array<i64: 1, 1, 256>}, {pipeline_mode = #tpu.pipeline_mode<synchronous>, transform_indices = @transform_4, window_bounds = array<i64: 256, 2>}, {transform_indices = @transform_5, window_bounds = array<i64: 1, 1>}, {transform_indices = @transform_6, window_bounds = array<i64: 1, 1>}]} {
    %c0_i32 = arith.constant 0 : i32
    %0 = arith.cmpi eq, %arg1, %c0_i32 : i32
    %1 = arith.extui %0 : i1 to i32
    %c0_i32_0 = arith.constant 0 : i32
    %2 = arith.cmpi ne, %1, %c0_i32_0 : i32
    scf.if %2 {
      %c0_10 = arith.constant 0 : index
      %c0_11 = arith.constant 0 : index
      %c0_12 = arith.constant 0 : index
      %20 = vector.load %arg4[%c0_10, %c0_11, %c0_12] : memref<1x128x128xbf16, #tpu.memory_space<vmem>>, vector<1x128x128xbf16>
      %21 = vector.shape_cast %20 : vector<1x128x128xbf16> to vector<128x128xbf16>
      %c0_i32_13 = arith.constant 0 : i32
      %22 = arith.cmpi eq, %arg0, %c0_i32_13 : i32
      %23 = arith.extui %22 : i1 to i32
      %c0_i32_14 = arith.constant 0 : i32
      %24 = arith.cmpi ne, %23, %c0_i32_14 : i32
      scf.if %24 {
        %c0_17 = arith.constant 0 : index
        %c0_18 = arith.constant 0 : index
        %28 = vector.load %arg2[%c0_17, %c0_18] : memref<256x256xbf16, #tpu.memory_space<vmem>>, vector<256x128xbf16>
        %cst_19 = arith.constant dense<0.000000e+00> : vector<256x128xf32>
        %29 = tpu.matmul %28, %21, %cst_19 {dimension_numbers = #tpu.dot_dimension_numbers<[1], [0], [0], [1], [0, 0, 1, 1], [], []>} : vector<256x128xbf16>, vector<128x128xbf16>, vector<256x128xf32> -> vector<256x128xf32>
        %c0_20 = arith.constant 0 : index
        %c128 = arith.constant 128 : index
        %30 = vector.load %arg2[%c0_20, %c128] : memref<256x256xbf16, #tpu.memory_space<vmem>>, vector<256x128xbf16>
        %cst_21 = arith.constant dense<0.000000e+00> : vector<256x128xf32>
        %31 = tpu.matmul %30, %21, %cst_21 {dimension_numbers = #tpu.dot_dimension_numbers<[1], [0], [0], [1], [0, 0, 1, 1], [], []>} : vector<256x128xbf16>, vector<128x128xbf16>, vector<256x128xf32> -> vector<256x128xf32>
        %32 = arith.truncf %29 : vector<256x128xf32> to vector<256x128xbf16>
        %c0_22 = arith.constant 0 : index
        %c0_23 = arith.constant 0 : index
        %33 = vector.load %arg9[%c0_22, %c0_23] : memref<256x256xbf16, #tpu.memory_space<vmem>>, vector<256x128xbf16>
        tpu.vector_store %arg9[%c0_22, %c0_23], %32 {strides = array<i32>} : memref<256x256xbf16, #tpu.memory_space<vmem>>, vector<256x128xbf16>,
        %34 = arith.truncf %31 : vector<256x128xf32> to vector<256x128xbf16>
        %c0_24 = arith.constant 0 : index
        %c128_25 = arith.constant 128 : index
        %35 = vector.load %arg9[%c0_24, %c128_25] : memref<256x256xbf16, #tpu.memory_space<vmem>>, vector<256x128xbf16>
        tpu.vector_store %arg9[%c0_24, %c128_25], %34 {strides = array<i32>} : memref<256x256xbf16, #tpu.memory_space<vmem>>, vector<256x128xbf16>,
      } else {
      }
      %c0_i32_15 = arith.constant 0 : i32
      %25 = arith.cmpi sgt, %arg0, %c0_i32_15 : i32
      %26 = arith.extui %25 : i1 to i32
      %c0_i32_16 = arith.constant 0 : i32
      %27 = arith.cmpi ne, %26, %c0_i32_16 : i32
      scf.if %27 {
        %c0_17 = arith.constant 0 : index
        %c0_18 = arith.constant 0 : index
        %28 = vector.load %arg10[%c0_17, %c0_18] : memref<256x256xbf16, #tpu.memory_space<vmem>>, vector<256x128xbf16>
        %cst_19 = arith.constant dense<0.000000e+00> : vector<256x128xf32>
        %29 = tpu.matmul %28, %21, %cst_19 {dimension_numbers = #tpu.dot_dimension_numbers<[1], [0], [0], [1], [0, 0, 1, 1], [], []>} : vector<256x128xbf16>, vector<128x128xbf16>, vector<256x128xf32> -> vector<256x128xf32>
        %c0_20 = arith.constant 0 : index
        %c128 = arith.constant 128 : index
        %30 = vector.load %arg10[%c0_20, %c128] : memref<256x256xbf16, #tpu.memory_space<vmem>>, vector<256x128xbf16>
        %cst_21 = arith.constant dense<0.000000e+00> : vector<256x128xf32>
        %31 = tpu.matmul %30, %21, %cst_21 {dimension_numbers = #tpu.dot_dimension_numbers<[1], [0], [0], [1], [0, 0, 1, 1], [], []>} : vector<256x128xbf16>, vector<128x128xbf16>, vector<256x128xf32> -> vector<256x128xf32>
        %32 = arith.truncf %29 : vector<256x128xf32> to vector<256x128xbf16>
        %c0_22 = arith.constant 0 : index
        %c0_23 = arith.constant 0 : index
        %33 = vector.load %arg9[%c0_22, %c0_23] : memref<256x256xbf16, #tpu.memory_space<vmem>>, vector<256x128xbf16>
        tpu.vector_store %arg9[%c0_22, %c0_23], %32 {strides = array<i32>} : memref<256x256xbf16, #tpu.memory_space<vmem>>, vector<256x128xbf16>,
        %34 = arith.truncf %31 : vector<256x128xf32> to vector<256x128xbf16>
        %c0_24 = arith.constant 0 : index
        %c128_25 = arith.constant 128 : index
        %35 = vector.load %arg9[%c0_24, %c128_25] : memref<256x256xbf16, #tpu.memory_space<vmem>>, vector<256x128xbf16>
        tpu.vector_store %arg9[%c0_24, %c128_25], %34 {strides = array<i32>} : memref<256x256xbf16, #tpu.memory_space<vmem>>, vector<256x128xbf16>,
      } else {
      }
    } else {
    }
    %c0 = arith.constant 0 : index
    %c0_1 = arith.constant 0 : index
    %3 = vector.load %arg3[%c0, %c0_1] : memref<128x256xbf16, #tpu.memory_space<vmem>>, vector<128x256xbf16>
    %c0_2 = arith.constant 0 : index
    %c0_3 = arith.constant 0 : index
    %4 = vector.load %arg9[%c0_2, %c0_3] : memref<256x256xbf16, #tpu.memory_space<vmem>>, vector<256x256xbf16>
    %cst = arith.constant dense<0.000000e+00> : vector<128x256xf32>
    %5 = tpu.matmul %3, %4, %cst {dimension_numbers = #tpu.dot_dimension_numbers<[1], [0], [0], [1], [0, 0, 1, 1], [], []>} : vector<128x256xbf16>, vector<256x256xbf16>, vector<128x256xf32> -> vector<128x256xf32>
    %c0_4 = arith.constant 0 : index
    %c0_5 = arith.constant 0 : index
    %c0_6 = arith.constant 0 : index
    %6 = vector.load %arg5[%c0_4, %c0_5, %c0_6] : memref<1x1x256xf32, #tpu.memory_space<vmem>>, vector<1x1x256xf32>
    %7 = vector.shape_cast %6 : vector<1x1x256xf32> to vector<1x256xf32>
    %8 = vector.broadcast %7 : vector<1x256xf32> to vector<128x256xf32>
    %9 = arith.addf %5, %8 : vector<128x256xf32>
    %cst_7 = arith.constant 0.000000e+00 : f32
    %10 = vector.broadcast %cst_7 : f32 to vector<128x256xf32>
    %11 = arith.maximumf %9, %10 : vector<128x256xf32>
    %12 = arith.truncf %11 : vector<128x256xf32> to vector<128x256xbf16>
    %c128_i32 = arith.constant 128 : i32
    %13 = arith.muli %arg1, %c128_i32 : i32
    %14 = tpu.assume_multiple %13, 128 : i32
    %15 = arith.index_cast %14 : i32 to index
    %c0_8 = arith.constant 0 : index
    %16 = vector.load %arg10[%15, %c0_8] : memref<256x256xbf16, #tpu.memory_space<vmem>>, vector<128x256xbf16>
    tpu.vector_store %arg10[%15, %c0_8], %12 {strides = array<i32>} : memref<256x256xbf16, #tpu.memory_space<vmem>>, vector<128x256xbf16>,
    %c1_i32 = arith.constant 1 : i32
    %17 = arith.cmpi eq, %arg0, %c1_i32 : i32
    %18 = arith.extui %17 : i1 to i32
    %c0_i32_9 = arith.constant 0 : i32
    %19 = arith.cmpi ne, %18, %c0_i32_9 : i32
    scf.if %19 {
      %c0_i32_10 = arith.constant 0 : i32
      %20 = arith.cmpi eq, %arg1, %c0_i32_10 : i32
      %21 = arith.extui %20 : i1 to i32
      %c0_i32_11 = arith.constant 0 : i32
      %22 = arith.cmpi ne, %21, %c0_i32_11 : i32
      scf.if %22 {
        %cst_26 = arith.constant 0.000000e+00 : f32
        %c0_27 = arith.constant 0 : index
        %66 = memref.load %arg11[%c0_27] : memref<1xf32, #tpu.memory_space<smem>>
        memref.store %cst_26, %arg11[%c0_27] : memref<1xf32, #tpu.memory_space<smem>>
      } else {
      }
      %c0_12 = arith.constant 0 : index
      %c0_13 = arith.constant 0 : index
      %23 = vector.load %arg6[%c0_12, %c0_13] : memref<256x2xbf16, #tpu.memory_space<vmem>>, vector<256x2xbf16>
      %cst_14 = arith.constant dense<0.000000e+00> : vector<128x2xf32>
      %24 = tpu.matmul %12, %23, %cst_14 {dimension_numbers = #tpu.dot_dimension_numbers<[1], [0], [0], [1], [0, 0, 1, 1], [], []>} : vector<128x256xbf16>, vector<256x2xbf16>, vector<128x2xf32> -> vector<128x2xf32>
      %c0_15 = arith.constant 0 : index
      %c0_16 = arith.constant 0 : index
      %25 = memref.load %arg7[%c0_15, %c0_16] : memref<1x1xf32, #tpu.memory_space<smem>>
      %26 = vector.broadcast %25 : f32 to vector<128x2xf32>
      %27 = arith.addf %24, %26 : vector<128x2xf32>
      %28 = vector.extract_strided_slice %27 {offsets = [0, 0], sizes = [128, 1], strides = [1, 1]} : vector<128x2xf32> to vector<128x1xf32>
      %29 = vector.extract_strided_slice %27 {offsets = [0, 1], sizes = [128, 1], strides = [1, 1]} : vector<128x2xf32> to vector<128x1xf32>
      %cst_17 = arith.constant 0.000000e+00 : f32
      %30 = vector.broadcast %cst_17 : f32 to vector<128x1xf32>
      %31 = arith.maximumf %28, %30 : vector<128x1xf32>
      %32 = arith.subf %31, %28 : vector<128x1xf32>
      %33 = math.absf %28 : vector<128x1xf32>
      %cst_18 = arith.constant 0.000000e+00 : f32
      %34 = vector.broadcast %cst_18 : f32 to vector<128x1xf32>
      %35 = arith.subf %34, %33 : vector<128x1xf32>
      %36 = math.exp %35 : vector<128x1xf32>
      %37 = math.log1p %36 : vector<128x1xf32>
      %38 = arith.addf %32, %37 : vector<128x1xf32>
      %cst_19 = arith.constant 0.000000e+00 : f32
      %39 = vector.broadcast %cst_19 : f32 to vector<128x1xf32>
      %40 = arith.maximumf %29, %39 : vector<128x1xf32>
      %41 = math.absf %29 : vector<128x1xf32>
      %cst_20 = arith.constant 0.000000e+00 : f32
      %42 = vector.broadcast %cst_20 : f32 to vector<128x1xf32>
      %43 = arith.subf %42, %41 : vector<128x1xf32>
      %44 = math.exp %43 : vector<128x1xf32>
      %45 = math.log1p %44 : vector<128x1xf32>
      %46 = arith.addf %40, %45 : vector<128x1xf32>
      %47 = tpu.iota {dimensions = array<i32: 0>} : vector<128x1xi32>
      %48 = vector.broadcast %14 : i32 to vector<128x1xi32>
      %49 = arith.addi %48, %47 : vector<128x1xi32>
      %c200_i32 = arith.constant 200 : i32
      %50 = vector.broadcast %c200_i32 : i32 to vector<128x1xi32>
      %51 = arith.cmpi slt, %49, %50 : vector<128x1xi32>
      %52 = arith.extui %51 : vector<128x1xi1> to vector<128x1xi32>
      %53 = arith.sitofp %52 : vector<128x1xi32> to vector<128x1xf32>
      %c0_21 = arith.constant 0 : index
      %54 = memref.load %arg11[%c0_21] : memref<1xf32, #tpu.memory_space<smem>>
      %55 = arith.addf %38, %46 : vector<128x1xf32>
      %56 = arith.mulf %55, %53 : vector<128x1xf32>
      %57 = vector.shape_cast %56 : vector<128x1xf32> to vector<1x128x1xf32>
      %cst_22 = arith.constant dense<0.000000e+00> : vector<1xf32>
      %58 = vector.multi_reduction <add>, %57, %cst_22 [1, 2] : vector<1x128x1xf32> to vector<1xf32>
      %59 = vector.shape_cast %58 : vector<1xf32> to vector<1x1x1xf32>
      %60 = vector.extract %59[0, 0, 0] : f32 from vector<1x1x1xf32>
      %61 = arith.addf %54, %60 : f32
      %c0_23 = arith.constant 0 : index
      %62 = memref.load %arg11[%c0_23] : memref<1xf32, #tpu.memory_space<smem>>
      memref.store %61, %arg11[%c0_23] : memref<1xf32, #tpu.memory_space<smem>>
      %c1_i32_24 = arith.constant 1 : i32
      %63 = arith.cmpi eq, %arg1, %c1_i32_24 : i32
      %64 = arith.extui %63 : i1 to i32
      %c0_i32_25 = arith.constant 0 : i32
      %65 = arith.cmpi ne, %64, %c0_i32_25 : i32
      scf.if %65 {
        %c0_26 = arith.constant 0 : index
        %66 = memref.load %arg11[%c0_26] : memref<1xf32, #tpu.memory_space<smem>>
        %cst_27 = arith.constant 4.000000e+02 : f32
        %67 = arith.divf %66, %cst_27 : f32
        %c0_28 = arith.constant 0 : index
        %c0_29 = arith.constant 0 : index
        %68 = memref.load %arg8[%c0_28, %c0_29] : memref<1x1xf32, #tpu.memory_space<smem>>
        memref.store %67, %arg8[%c0_28, %c0_29] : memref<1x1xf32, #tpu.memory_space<smem>>
      } else {
      }
    } else {
    }
    return
  }
  func.func @transform_0(%arg0: i32, %arg1: i32) -> (i32, i32) {
    %c0_i32 = arith.constant 0 : i32
    %c0_i32_0 = arith.constant 0 : i32
    %c0_i32_1 = arith.constant 0 : i32
    return %c0_i32, %c0_i32_0 : i32, i32
  }
  func.func @transform_1(%arg0: i32, %arg1: i32) -> (i32, i32) {
    %c0_i32 = arith.constant 0 : i32
    %c0_i32_0 = arith.constant 0 : i32
    return %arg1, %c0_i32 : i32, i32
  }
  func.func @transform_2(%arg0: i32, %arg1: i32) -> (i32, i32, i32) {
    %c0_i32 = arith.constant 0 : i32
    %c0_i32_0 = arith.constant 0 : i32
    %c0_i32_1 = arith.constant 0 : i32
    return %arg0, %c0_i32, %c0_i32_0 : i32, i32, i32
  }
  func.func @transform_3(%arg0: i32, %arg1: i32) -> (i32, i32, i32) {
    %c0_i32 = arith.constant 0 : i32
    %c0_i32_0 = arith.constant 0 : i32
    %c0_i32_1 = arith.constant 0 : i32
    return %arg0, %c0_i32, %c0_i32_0 : i32, i32, i32
  }
  func.func @transform_4(%arg0: i32, %arg1: i32) -> (i32, i32) {
    %c0_i32 = arith.constant 0 : i32
    %c0_i32_0 = arith.constant 0 : i32
    %c0_i32_1 = arith.constant 0 : i32
    return %c0_i32, %c0_i32_0 : i32, i32
  }
  func.func @transform_5(%arg0: i32, %arg1: i32) -> (i32, i32) {
    %c0_i32 = arith.constant 0 : i32
    %c0_i32_0 = arith.constant 0 : i32
    %c0_i32_1 = arith.constant 0 : i32
    return %c0_i32, %c0_i32_0 : i32, i32
  }
  func.func @transform_6(%arg0: i32, %arg1: i32) -> (i32, i32) {
    %c0_i32 = arith.constant 0 : i32
    %c0_i32_0 = arith.constant 0 : i32
    %c0_i32_1 = arith.constant 0 : i32
    return %c0_i32, %c0_i32_0 : i32, i32
  }
}

</mosaic_0001>

<bundles_post_ra>
// kernel: tpu_custom_call.1
= control target key start
LH: loop header
LB: loop body
LE: loop exit
PB: predicated region body
PF: predicated region fallthrough
CT: control target
= control target key end

     0   :  { %s5936_s0 = inlined_call_operand.hbm [shape: bf16[256,256], index: 0, kind: input, shape index: {}]   ;;  %s5937_s1 = inlined_call_operand.hbm [shape: bf16[256,256], index: 1, kind: input, shape index: {}]   ;;  %s5938_s2 = inlined_call_operand.vmem [shape: bf16[2,128,128], index: 2, kind: input, shape index: {}]   ;;  %s5939_s3 = inlined_call_operand.vmem [shape: f32[2,1,256], index: 3, kind: input, shape index: {}]   ;;  %s5940_s4 = inlined_call_operand.vmem [shape: bf16[256,2], index: 4, kind: input, shape index: {}]   ;;  %s5941_s5 = inlined_call_operand.<no memory space> [shape: f32[1,1], index: 5, kind: input, shape index: {}]   ;;  %s5942_s6 = inlined_call_operand.hbm [shape: f32[1,1], index: 6, kind: output, shape index: {}]  }
   0x1   :  { %5951 = sst [smem:[#allocation15_spill]] %s5936_s0 }
   0x2   :  { %11 = sst [smem:[#allocation5]] %s5941_s5 }
   0x3   :  { %12 = vsyncpa [#allocation7], 0 }
   0x4   :  { %13 = vsyncpa [#allocation10], 0 }
   0x5   :  { %15 = vsyncpa [#allocation10 + $0x1], 0 }
   0x6   :  { %16 = vsyncpa [#allocation8], 0  ;;  %s5039_s23 = smov 0   ;;  %s5041_s24 = smov 0  }
   0x7   :  { %s5043_s25 = smov 0   ;;  %s5045_s26 = smov 0  }
   0x8   :  { %s5047_s27 = smov 0   ;;  %s5049_s28 = smov 0  }
   0x9   :  { %s5051_s29 = smov 0   ;;  %s5053_s30 = smov 0  }
   0xa LB: > { %s5943_s5 = sadd.s32 4294967295, %s4991_s30   ;;  %p75_p0 = scmp.ne.s32.totalorder %s4967_s24, %s4963_s23  ;;  %s4991_s30 = sphi %s5053_s30, %s22_s30   ;;  %s4987_s29 = sphi %s5051_s29, %s5991_s29   ;;  %s4983_s28 = sphi %s5049_s28, %s5990_s28   ;;  %s4979_s27 = sphi %s5047_s27, %s5989_s27   ;;  %s4975_s26 = sphi %s5045_s26, %s5988_s26   ;;  %s4971_s25 = sphi %s5043_s25, %s5987_s25   ;;  %s4967_s24 = sphi %s5041_s24, %s5986_s24   ;;  %s4963_s23 = sphi %s5039_s23, %s5985_s23  }
   0xb   : > { %p5081_p1 = scmp.eq.s32.totalorder %s5943_s5, 0  ;;  %p3657_p2 = scmp.ge.s32.totalorder %s4991_s30, 1 }
   0xc   : > { %p201_p3 = scmp.lt.s32.totalorder %s4991_s30, 5  ;;  %s4993_s10 = smov [#allocation6]  }
   0xd   : > { %p5089_p4 = por %p5081_p1, %p75_p0  ;;  %s213_s11 = sshll.u32 %s4993_s10, 4  ;;  %s214_s11 = int_to_ptr.vmem [resolvable:$true] %s213_s11 }
   0xe   : > { %p5093_p5 = pnand %p3657_p2, %p201_p3  ;;  %s4864_s12 = scalar_lea.vmem %s214_s11, 4096 }
   0xf   : > { %p4865_p9 = scmp.ne.s32.totalorder %s214_s11, %s4864_s12  ;;  %p4872_p12 = scmp.lt.s32.totalorder %s214_s11, %s214_s11 }
  0x10   : > { %p4551_p6 = pneg %p5093_p5  ;;  %p4873_p13 = scmp.lt.s32.totalorder %s4864_s12, %s4864_s12 }
  0x12   : > { %p4552_p7 = pnand %p4551_p6, %p5081_p1  ;;  %p4874_p0 = por %p4873_p13, %p4872_p12 }
  0x14   : > { %p4855_p8 = pneg %p4552_p7 }
  0x16   : > { %p4867_p10 = pnand %p4865_p9, %p4855_p8 }
  0x18   : > { %p4868_p11 = pneg %p4867_p10 }
  0x1a   : > { %p4875_p2 = pnand %p4874_p0, %p4868_p11 }
  0x1c   : > { %4878 = shalt.err (!%p4875_p2)
}
  0x1d   : > { %s5944_s13 = smov 128   ;;  %s5945_s14 = smov 8  }
  0x1e   : > { %s5955_s0 = sld [smem:[#allocation15_spill]]  ;;  %s31_s17 = sadd.s32 1, %s4983_s28 }
  0x1f   : > { %p32_p3 = scmp.ge.s32.totalorder %s31_s17, 2  ;;  %s34_s18 = sadd.s32 1, %s4987_s29 }
  0x20   : > { %s62_s19 = sadd.s32 1, %s4971_s25  ;;  %p69_p6 = scmp.ne.s32.totalorder %s4971_s25, %s4967_s24 }
  0x21   : > { %s5993_s17 = smov (%p32_p3, %s31_s17), 0  ;;  %s5995_s18 = smov (!%p32_p3, %s34_s18), %s4987_s29 }
  0x22   : > { %s59_s20 = ssub.s32 %s4983_s28, %s5993_s17  ;;  %p70_p8 = scmp.eq.s32.totalorder %s4991_s30, 0 }
  0x23   : > { %p36_p9 = scmp.ge.s32.totalorder %s5995_s18, 2  ;;  %p60_p10 = scmp.eq.s32.totalorder %s59_s20, 0 }
  0x24   : > { %4554 = dma.hbm_to_vmem [thread:$0]  (!%p4552_p7), %s5955_s0, 4096, %s214_s11, [#allocation7], %s5944_s13, %s5944_s13, %s5945_s14  }
  0x25   : > { %p71_p11 = por %p70_p8, %p69_p6  ;;  %p4560_p12 = scmp.lt.s32.totalorder %s4991_s30, 4 }
  0x26   : > { %s5997_s18 = smov (%p36_p9, %s5995_s18), 0  ;;  %s233_s22 = sand.u32 1, %s4971_s25  }
  0x27   : > { %s5122_s21 = scalar_select %p60_p10, %s4971_s25, %s62_s19  }
  0x28   : > { %s3988_s23 = sshll.u32 %s4983_s28, 11  ;;  %s3660_s10 = sshll.u32 %s233_s22, 7 }
  0x29   : > { %s244_s15 = scalar_lea.hbm %s5937_s1, %s3988_s23  ;;  %s237_s16 = scalar_lea.vmem [#allocation9], %s3660_s10 }
  0x2a   : > { %s245_s5 = sshll.u32 %s237_s16, 4  ;;  %p5129_p7 = pnand %p4560_p12, %p71_p11  ;;  %s246_s5 = int_to_ptr.vmem [resolvable:$true] %s245_s5 }
  0x2b   : > { %s234_s20 = scalar_lea.sflag [#allocation10], %s233_s22  ;;  %s4892_s19 = scalar_lea.vmem %s246_s5, 2048 }
  0x2c   : > { %p4881_p13 = pneg %p5129_p7  ;;  %p4893_p0 = scmp.ne.s32.totalorder %s246_s5, %s4892_s19 }
  0x2d   : > { %s4996_s14 = smov [#allocation9]  }
  0x2e   : > { %p4895_p2 = pnand %p4893_p0, %p4881_p13  ;;  %s4897_s0 = sshll.u32 %s4996_s14, 4  ;;  %s4898_s0 = int_to_ptr.vmem [resolvable:$false] %s4897_s0 }
  0x2f   : > { %s4899_s11 = scalar_lea.vmem %s4898_s0, 4096  ;;  %p4900_p6 = scmp.lt.s32.totalorder %s246_s5, %s4898_s0 }
  0x30   : > { %p4896_p3 = pneg %p4895_p2  ;;  %p4901_p8 = scmp.lt.s32.totalorder %s4899_s11, %s4892_s19 }
  0x32   : > { %p4902_p9 = por %p4901_p8, %p4900_p6 }
  0x34   : > { %p4903_p10 = pnand %p4902_p9, %p4896_p3 }
  0x36   : > { %4906 = shalt.err (!%p4903_p10)
}
  0x37   : > { %s5957_s23 = smov 8   ;;  %s5958_s10 = smov 128  }
  0x38   : > { %4558 = dma.hbm_to_vmem [thread:$0]  (!%p5129_p7), %s244_s15, 2048, %s246_s5, %s234_s20, %s5958_s10, %s5958_s10, %s5957_s23  }
  0x39   : > { %272 = sbr.rel (%p5093_p5) target bundleno = 1623 (0x657), region = 44 }
  0x3e   : > { %4950 = dma.done.wait (%p5081_p1), [#allocation7], 4096  }
  0x3f   : > { %4952 = vsyncadd (%p5081_p1), [#allocation7], 4294963200  ;;  %s278_s0 = sand.u32 1, %s4967_s24  }
  0x40   : > { %s3666_s14 = sshll.u32 %s278_s0, 7  ;;  %s279_s22 = scalar_lea.sflag [#allocation10], %s278_s0 }
  0x41   : > { %s5147_s12 = scalar_lea.vmem [#allocation9], %s3666_s14 }
  0x42   : > { %4954 = dma.done.wait (%p5089_p4), %s279_s22, 2048  }
  0x43   : > { %4956 = vsyncadd (%p5089_p4), %s279_s22, 4294965248  ;;  %p316_p5 = scmp.lt.s32.totalorder %s4979_s27, 1  ;;  %p3670_p1 = scmp.ne.s32.totalorder %s4975_s26, 0 }
  0x44   : > { %p3671_p4 = scmp.ne.s32.totalorder (!%p3670_p1), %s4979_s27, 0 }
  0x45   : > { %s317_s5 = scalar_select %p316_p5, %s4979_s27, 1 }
  0x46   : > { %329 = sbr.rel (%p3670_p1) target bundleno = 676 (0x2a4), region = 56 }
  0x47   : > { %s3989_s9 = sshll.u32 %s317_s5, 6  ;;  %s3669_s13 = sshll.u32 %s317_s5, 1 }
  0x48   : > { %s320_s16 = scalar_lea.vmem %s5938_s2, %s3989_s9  ;;  %s5161_s11 = scalar_lea.vmem %s5939_s3, %s3669_s13 }
  0x4b   : > { %v5164_v0 = vld [vmem:[%s320_s16] sm:$0xf]  ;;  %v5166_v1 = vld [vmem:[%s320_s16 + $0x4] sm:$0xf]  ;;  %v5168_v2 = vld [vmem:[%s320_s16 + $0x8] sm:$0xf] }
  0x4c   : > { %v5170_v3 = vld [vmem:[%s320_s16 + $0xc] sm:$0xf]  ;;  %v5172_v4 = vld [vmem:[%s320_s16 + $0x10] sm:$0xf]  ;;  %v5174_v5 = vld [vmem:[%s320_s16 + $0x14] sm:$0xf] }
  0x4d   : > { %v5176_v6 = vld [vmem:[%s320_s16 + $0x18] sm:$0xf]  ;;  %v5178_v7 = vld [vmem:[%s320_s16 + $0x1c] sm:$0xf]  ;;  %v5180_v8 = vld [vmem:[%s320_s16 + $0x20] sm:$0xf] }
  0x4e   : > { %v5182_v9 = vld [vmem:[%s320_s16 + $0x24] sm:$0xf]  ;;  %v5184_v10 = vld [vmem:[%s320_s16 + $0x28] sm:$0xf]  ;;  %v5186_v11 = vld [vmem:[%s320_s16 + $0x2c] sm:$0xf] }
  0x4f   : > { %v5188_v12 = vld [vmem:[%s320_s16 + $0x30] sm:$0xf]  ;;  %v5190_v13 = vld [vmem:[%s320_s16 + $0x34] sm:$0xf]  ;;  %v5192_v14 = vld [vmem:[%s320_s16 + $0x38] sm:$0xf] }
  0x50   : > { %v5194_v15 = vld [vmem:[%s320_s16 + $0x3c] sm:$0xf]  ;;  %349 = sbr.rel (%p3671_p4) target bundleno = 377 (0x179), region = 60 }
  0x55   : > { %v3695_v16 = vcombine.low %v5192_v14, %v5194_v15  ;;  %v3694_v17 = vcombine.low %v5188_v12, %v5190_v13  ;;  %v4637_v18 = vld [vmem:[#allocation6] ss:$8 sps:$4 sm:$0xff]   ;;  %v4638_v19 = vld [vmem:[#allocation6 + $0x4] ss:$8 sps:$4 sm:$0xff]   ;;  %v3693_v20 = vcombine.low %v5184_v10, %v5186_v11  ;;  %v3692_v21 = vcombine.low %v5180_v8, %v5182_v9  ;;  %v4639_v26 = vld [vmem:[#allocation6 + $0x10] ss:$8 sps:$4 sm:$0xff]  }
  0x56   : > { %4311 = vmatprep.mubr.bf16.mxu0 %v4637_v18  ;;  %4359 = vmatprep.mubr.bf16.mxu1 %v4638_v19  ;;  %v3691_v22 = vcombine.low %v5176_v6, %v5178_v7  ;;  %v3690_v23 = vcombine.low %v5172_v4, %v5174_v5  ;;  %v3689_v24 = vcombine.low %v5168_v2, %v5170_v3  ;;  %v4640_v27 = vld [vmem:[#allocation6 + $0x14] ss:$8 sps:$4 sm:$0xff]   ;;  %v4641_v28 = vld [vmem:[#allocation6 + $0x20] ss:$8 sps:$4 sm:$0xff]   ;;  %v4642_v29 = vld [vmem:[#allocation6 + $0x24] ss:$8 sps:$4 sm:$0xff]  }
  0x57   : > { %4295 = vmatprep.subr.bf16.mxu0 %v3695_v16  ;;  %4343 = vmatprep.subr.bf16.mxu1 %v3695_v16  ;;  %v3688_v25 = vcombine.low %v5164_v0, %v5166_v1  ;;  %v4643_v30 = vld [vmem:[#allocation6 + $0x30] ss:$8 sps:$4 sm:$0xff]   ;;  %v4644_v31 = vld [vmem:[#allocation6 + $0x34] ss:$8 sps:$4 sm:$0xff]   ;;  %v4645_v32 = vld [vmem:[#allocation6 + $0x40] ss:$8 sps:$4 sm:$0xff]  }
  0x58   : > { %4296 = vmatpush3.bf16.msra.mxu0 %v3695_v16  ;;  %4344 = vmatpush3.bf16.msra.mxu1 %v3695_v16  ;;  %v4646_v33 = vld [vmem:[#allocation6 + $0x44] ss:$8 sps:$4 sm:$0xff]   ;;  %v4647_v34 = vld [vmem:[#allocation6 + $0x50] ss:$8 sps:$4 sm:$0xff]   ;;  %v4648_v35 = vld [vmem:[#allocation6 + $0x54] ss:$8 sps:$4 sm:$0xff]  }
  0x59   : > { %4297 = vmatprep.subr.bf16.mxu0 %v3694_v17  ;;  %4345 = vmatprep.subr.bf16.mxu1 %v3694_v17  ;;  %v4649_v36 = vld [vmem:[#allocation6 + $0x60] ss:$8 sps:$4 sm:$0xff]   ;;  %v4650_v37 = vld [vmem:[#allocation6 + $0x64] ss:$8 sps:$4 sm:$0xff]   ;;  %v4651_v38 = vld [vmem:[#allocation6 + $0x70] ss:$8 sps:$4 sm:$0xff]  }
  0x5a   : > { %v4652_v39 = vld [vmem:[#allocation6 + $0x74] ss:$8 sps:$4 sm:$0xff]   ;;  %v4653_v40 = vld [vmem:[#allocation6 + $0x80] ss:$8 sps:$4 sm:$0xff]   ;;  %v4654_v41 = vld [vmem:[#allocation6 + $0x84] ss:$8 sps:$4 sm:$0xff]  }
  0x5b   : > { %v4655_v42 = vld [vmem:[#allocation6 + $0x90] ss:$8 sps:$4 sm:$0xff]   ;;  %v4656_v43 = vld [vmem:[#allocation6 + $0x94] ss:$8 sps:$4 sm:$0xff]   ;;  %v4657_v44 = vld [vmem:[#allocation6 + $0xa0] ss:$8 sps:$4 sm:$0xff]  }
  0x5c   : > { %4298 = vmatpush3.bf16.msra.mxu0 %v3694_v17  ;;  %4346 = vmatpush3.bf16.msra.mxu1 %v3694_v17  ;;  %v4658_v45 = vld [vmem:[#allocation6 + $0xa4] ss:$8 sps:$4 sm:$0xff]   ;;  %v4659_v46 = vld [vmem:[#allocation6 + $0xb0] ss:$8 sps:$4 sm:$0xff]   ;;  %v4660_v47 = vld [vmem:[#allocation6 + $0xb4] ss:$8 sps:$4 sm:$0xff]  }
  0x5d   : > { %4299 = vmatprep.subr.bf16.mxu0 %v3693_v20  ;;  %4347 = vmatprep.subr.bf16.mxu1 %v3693_v20  ;;  %v4661_v48 = vld [vmem:[#allocation6 + $0xc0] ss:$8 sps:$4 sm:$0xff]   ;;  %v4662_v49 = vld [vmem:[#allocation6 + $0xc4] ss:$8 sps:$4 sm:$0xff]   ;;  %v4663_v50 = vld [vmem:[#allocation6 + $0xd0] ss:$8 sps:$4 sm:$0xff]  }
  0x5e   : > { %v4664_v51 = vld [vmem:[#allocation6 + $0xd4] ss:$8 sps:$4 sm:$0xff]   ;;  %v4665_v52 = vld [vmem:[#allocation6 + $0xe0] ss:$8 sps:$4 sm:$0xff]   ;;  %v4666_v53 = vld [vmem:[#allocation6 + $0xe4] ss:$8 sps:$4 sm:$0xff]  }
  0x5f   : > { %v4667_v54 = vld [vmem:[#allocation6 + $0xf0] ss:$8 sps:$4 sm:$0xff]   ;;  %v4668_v55 = vld [vmem:[#allocation6 + $0xf4] ss:$8 sps:$4 sm:$0xff]  }
  0x60   : > { %4300 = vmatpush3.bf16.msra.mxu0 %v3693_v20  ;;  %4348 = vmatpush3.bf16.msra.mxu1 %v3693_v20 }
  0x61   : > { %4301 = vmatprep.subr.bf16.mxu0 %v3692_v21  ;;  %4349 = vmatprep.subr.bf16.mxu1 %v3692_v21 }
  0x64   : > { %4302 = vmatpush3.bf16.msra.mxu0 %v3692_v21  ;;  %4350 = vmatpush3.bf16.msra.mxu1 %v3692_v21 }
  0x65   : > { %4303 = vmatprep.subr.bf16.mxu0 %v3691_v22  ;;  %4351 = vmatprep.subr.bf16.mxu1 %v3691_v22 }
  0x68   : > { %4304 = vmatpush3.bf16.msra.mxu0 %v3691_v22  ;;  %4352 = vmatpush3.bf16.msra.mxu1 %v3691_v22 }
  0x69   : > { %4305 = vmatprep.subr.bf16.mxu0 %v3690_v23  ;;  %4353 = vmatprep.subr.bf16.mxu1 %v3690_v23 }
  0x6c   : > { %4306 = vmatpush3.bf16.msra.mxu0 %v3690_v23  ;;  %4354 = vmatpush3.bf16.msra.mxu1 %v3690_v23 }
  0x6d   : > { %4307 = vmatprep.subr.bf16.mxu0 %v3689_v24  ;;  %4355 = vmatprep.subr.bf16.mxu1 %v3689_v24 }
  0x70   : > { %4308 = vmatpush3.bf16.msra.mxu0 %v3689_v24  ;;  %4356 = vmatpush3.bf16.msra.mxu1 %v3689_v24 }
  0x71   : > { %4309 = vmatprep.subr.bf16.mxu0 %v3688_v25  ;;  %4357 = vmatprep.subr.bf16.mxu1 %v3688_v25 }
  0x74   : > { %4310 = vmatpush3.bf16.msra.mxu0 %v3688_v25  ;;  %4358 = vmatpush3.bf16.msra.mxu1 %v3688_v25 }
  0x77   : > { %4312 = vmatmul.mubr.bf16.vlgmr.msra.gmra.mxu0 %v4639_v26  ;;  %4360 = vmatmul.mubr.bf16.vlgmr.msra.gmra.mxu1 %v4640_v27 }
  0x78   : > { %4315 = vmatprep.mubr.bf16.mxu0 %v4641_v28  ;;  %4363 = vmatprep.mubr.bf16.mxu1 %v4642_v29 }
  0x7f   : > { %4316 = vmatmul.mubr.bf16.gmra.mxu0 %v4643_v30  ;;  %4364 = vmatmul.mubr.bf16.gmra.mxu1 %v4644_v31 }
  0x80   : > { %4319 = vmatprep.mubr.bf16.mxu0 %v4645_v32  ;;  %4367 = vmatprep.mubr.bf16.mxu1 %v4646_v33 }
  0x87   : > { %4320 = vmatmul.mubr.bf16.gmra.mxu0 %v4647_v34  ;;  %4368 = vmatmul.mubr.bf16.gmra.mxu1 %v4648_v35 }
  0x88   : > { %4323 = vmatprep.mubr.bf16.mxu0 %v4649_v36  ;;  %4371 = vmatprep.mubr.bf16.mxu1 %v4650_v37 }
  0x8f   : > { %4324 = vmatmul.mubr.bf16.gmra.mxu0 %v4651_v38  ;;  %4372 = vmatmul.mubr.bf16.gmra.mxu1 %v4652_v39 }
  0x90   : > { %4327 = vmatprep.mubr.bf16.mxu0 %v4653_v40  ;;  %4375 = vmatprep.mubr.bf16.mxu1 %v4654_v41 }
  0x97   : > { %4328 = vmatmul.mubr.bf16.gmra.mxu0 %v4655_v42  ;;  %4376 = vmatmul.mubr.bf16.gmra.mxu1 %v4656_v43 }
  0x98   : > { %4331 = vmatprep.mubr.bf16.mxu0 %v4657_v44  ;;  %4379 = vmatprep.mubr.bf16.mxu1 %v4658_v45 }
  0x9f   : > { %4332 = vmatmul.mubr.bf16.gmra.mxu0 %v4659_v46  ;;  %4380 = vmatmul.mubr.bf16.gmra.mxu1 %v4660_v47 }
  0xa0   : > { %4335 = vmatprep.mubr.bf16.mxu0 %v4661_v48  ;;  %4383 = vmatprep.mubr.bf16.mxu1 %v4662_v49 }
  0xa7   : > { %4336 = vmatmul.mubr.bf16.gmra.mxu0 %v4663_v50  ;;  %4384 = vmatmul.mubr.bf16.gmra.mxu1 %v4664_v51 }
  0xa8   : > { %4339 = vmatprep.mubr.bf16.mxu0 %v4665_v52  ;;  %4387 = vmatprep.mubr.bf16.mxu1 %v4666_v53 }
  0xaf   : > { %4340 = vmatmul.mubr.bf16.gmra.mxu0 %v4667_v54  ;;  %4388 = vmatmul.mubr.bf16.gmra.mxu1 %v4668_v55 }
 0x137   : > { %v4313_v56 = vpop.f32.mrf.mxu0  ;;  %v4361_v57 = vpop.f32.mrf.mxu1 }
 0x138   : > { %v3992_v58 = vpack.c.bf16 %v4313_v56, %v4313_v56  ;;  %v4024_v59 = vpack.c.bf16 %v4361_v57, %v4361_v57 }
 0x139   : > { %v560_v60 = vpop.f32.mrf.mxu0  ;;  %v849_v61 = vpop.f32.mrf.mxu1 }
 0x13a   : > { %1106 = vst [vmem:[#allocation2 + $0x10] sm:$0xf] %v3992_v58  ;;  %1266 = vst [vmem:[#allocation2 + $0x14] sm:$0xf] %v4024_v59  ;;  %v3990_v62 = vpack.c.bf16 %v560_v60, %v560_v60  ;;  %v4022_v63 = vpack.c.bf16 %v849_v61, %v849_v61 }
 0x13b   : > { %v4314_v16 = vpop.f32.mrf.mxu0  ;;  %v4362_v17 = vpop.f32.mrf.mxu1 }
 0x13c   : > { %1104 = vst [vmem:[#allocation2] sm:$0xf] %v3990_v62  ;;  %1264 = vst [vmem:[#allocation2 + $0x4] sm:$0xf] %v4022_v63  ;;  %v3993_v18 = vpack.c.bf16 %v4314_v16, %v4314_v16  ;;  %v4025_v19 = vpack.c.bf16 %v4362_v17, %v4362_v17 }
 0x13d   : > { %v563_v20 = vpop.f32.mrf.mxu0  ;;  %v852_v21 = vpop.f32.mrf.mxu1 }
 0x13e   : > { %1107 = vst [vmem:[#allocation2 + $0x18] sm:$0xf] %v3993_v18  ;;  %1267 = vst [vmem:[#allocation2 + $0x1c] sm:$0xf] %v4025_v19  ;;  %v3991_v22 = vpack.c.bf16 %v563_v20, %v563_v20  ;;  %v4023_v23 = vpack.c.bf16 %v852_v21, %v852_v21 }
 0x13f   : > { %v4317_v24 = vpop.f32.mrf.mxu0  ;;  %v4365_v25 = vpop.f32.mrf.mxu1 }
 0x140   : > { %1105 = vst [vmem:[#allocation2 + $0x8] sm:$0xf] %v3991_v22  ;;  %1265 = vst [vmem:[#allocation2 + $0xc] sm:$0xf] %v4023_v23  ;;  %v3996_v26 = vpack.c.bf16 %v4317_v24, %v4317_v24  ;;  %v4028_v27 = vpack.c.bf16 %v4365_v25, %v4365_v25 }
 0x141   : > { %v576_v28 = vpop.f32.mrf.mxu0  ;;  %v865_v29 = vpop.f32.mrf.mxu1 }
 0x142   : > { %1110 = vst [vmem:[#allocation2 + $0x30] sm:$0xf] %v3996_v26  ;;  %1270 = vst [vmem:[#allocation2 + $0x34] sm:$0xf] %v4028_v27  ;;  %v3994_v30 = vpack.c.bf16 %v576_v28, %v576_v28  ;;  %v4026_v31 = vpack.c.bf16 %v865_v29, %v865_v29 }
 0x143   : > { %v4318_v32 = vpop.f32.mrf.mxu0  ;;  %v4366_v33 = vpop.f32.mrf.mxu1 }
 0x144   : > { %1108 = vst [vmem:[#allocation2 + $0x20] sm:$0xf] %v3994_v30  ;;  %1268 = vst [vmem:[#allocation2 + $0x24] sm:$0xf] %v4026_v31  ;;  %v3997_v34 = vpack.c.bf16 %v4318_v32, %v4318_v32  ;;  %v4029_v35 = vpack.c.bf16 %v4366_v33, %v4366_v33 }
 0x145   : > { %v579_v36 = vpop.f32.mrf.mxu0  ;;  %v868_v37 = vpop.f32.mrf.mxu1 }
 0x146   : > { %1111 = vst [vmem:[#allocation2 + $0x38] sm:$0xf] %v3997_v34  ;;  %1271 = vst [vmem:[#allocation2 + $0x3c] sm:$0xf] %v4029_v35  ;;  %v3995_v38 = vpack.c.bf16 %v579_v36, %v579_v36  ;;  %v4027_v39 = vpack.c.bf16 %v868_v37, %v868_v37 }
 0x147   : > { %v4321_v40 = vpop.f32.mrf.mxu0  ;;  %v4369_v41 = vpop.f32.mrf.mxu1 }
 0x148   : > { %1109 = vst [vmem:[#allocation2 + $0x28] sm:$0xf] %v3995_v38  ;;  %1269 = vst [vmem:[#allocation2 + $0x2c] sm:$0xf] %v4027_v39  ;;  %v4000_v42 = vpack.c.bf16 %v4321_v40, %v4321_v40  ;;  %v4032_v43 = vpack.c.bf16 %v4369_v41, %v4369_v41 }
 0x149   : > { %v592_v44 = vpop.f32.mrf.mxu0  ;;  %v881_v45 = vpop.f32.mrf.mxu1 }
 0x14a   : > { %1114 = vst [vmem:[#allocation2 + $0x50] sm:$0xf] %v4000_v42  ;;  %1274 = vst [vmem:[#allocation2 + $0x54] sm:$0xf] %v4032_v43  ;;  %v3998_v46 = vpack.c.bf16 %v592_v44, %v592_v44  ;;  %v4030_v47 = vpack.c.bf16 %v881_v45, %v881_v45 }
 0x14b   : > { %v4322_v48 = vpop.f32.mrf.mxu0  ;;  %v4370_v49 = vpop.f32.mrf.mxu1 }
 0x14c   : > { %1112 = vst [vmem:[#allocation2 + $0x40] sm:$0xf] %v3998_v46  ;;  %1272 = vst [vmem:[#allocation2 + $0x44] sm:$0xf] %v4030_v47  ;;  %v4001_v50 = vpack.c.bf16 %v4322_v48, %v4322_v48  ;;  %v4033_v51 = vpack.c.bf16 %v4370_v49, %v4370_v49 }
 0x14d   : > { %v595_v52 = vpop.f32.mrf.mxu0  ;;  %v884_v53 = vpop.f32.mrf.mxu1 }
 0x14e   : > { %1115 = vst [vmem:[#allocation2 + $0x58] sm:$0xf] %v4001_v50  ;;  %1275 = vst [vmem:[#allocation2 + $0x5c] sm:$0xf] %v4033_v51  ;;  %v3999_v54 = vpack.c.bf16 %v595_v52, %v595_v52  ;;  %v4031_v55 = vpack.c.bf16 %v884_v53, %v884_v53 }
 0x14f   : > { %v4325_v56 = vpop.f32.mrf.mxu0  ;;  %v4373_v57 = vpop.f32.mrf.mxu1 }
 0x150   : > { %1113 = vst [vmem:[#allocation2 + $0x48] sm:$0xf] %v3999_v54  ;;  %1273 = vst [vmem:[#allocation2 + $0x4c] sm:$0xf] %v4031_v55  ;;  %v4004_v58 = vpack.c.bf16 %v4325_v56, %v4325_v56  ;;  %v4036_v59 = vpack.c.bf16 %v4373_v57, %v4373_v57 }
 0x151   : > { %v608_v60 = vpop.f32.mrf.mxu0  ;;  %v897_v61 = vpop.f32.mrf.mxu1 }
 0x152   : > { %1118 = vst [vmem:[#allocation2 + $0x70] sm:$0xf] %v4004_v58  ;;  %1278 = vst [vmem:[#allocation2 + $0x74] sm:$0xf] %v4036_v59  ;;  %v4002_v62 = vpack.c.bf16 %v608_v60, %v608_v60  ;;  %v4034_v63 = vpack.c.bf16 %v897_v61, %v897_v61 }
 0x153   : > { %v4326_v16 = vpop.f32.mrf.mxu0  ;;  %v4374_v17 = vpop.f32.mrf.mxu1 }
 0x154   : > { %1116 = vst [vmem:[#allocation2 + $0x60] sm:$0xf] %v4002_v62  ;;  %1276 = vst [vmem:[#allocation2 + $0x64] sm:$0xf] %v4034_v63  ;;  %v4005_v18 = vpack.c.bf16 %v4326_v16, %v4326_v16  ;;  %v4037_v19 = vpack.c.bf16 %v4374_v17, %v4374_v17 }
 0x155   : > { %v611_v20 = vpop.f32.mrf.mxu0  ;;  %v900_v21 = vpop.f32.mrf.mxu1 }
 0x156   : > { %1119 = vst [vmem:[#allocation2 + $0x78] sm:$0xf] %v4005_v18  ;;  %1279 = vst [vmem:[#allocation2 + $0x7c] sm:$0xf] %v4037_v19  ;;  %v4003_v22 = vpack.c.bf16 %v611_v20, %v611_v20  ;;  %v4035_v23 = vpack.c.bf16 %v900_v21, %v900_v21 }
 0x157   : > { %v4329_v24 = vpop.f32.mrf.mxu0  ;;  %v4377_v25 = vpop.f32.mrf.mxu1 }
 0x158   : > { %1117 = vst [vmem:[#allocation2 + $0x68] sm:$0xf] %v4003_v22  ;;  %1277 = vst [vmem:[#allocation2 + $0x6c] sm:$0xf] %v4035_v23  ;;  %v4008_v26 = vpack.c.bf16 %v4329_v24, %v4329_v24  ;;  %v4040_v27 = vpack.c.bf16 %v4377_v25, %v4377_v25 }
 0x159   : > { %v624_v28 = vpop.f32.mrf.mxu0  ;;  %v913_v29 = vpop.f32.mrf.mxu1 }
 0x15a   : > { %1122 = vst [vmem:[#allocation2 + $0x90] sm:$0xf] %v4008_v26  ;;  %1282 = vst [vmem:[#allocation2 + $0x94] sm:$0xf] %v4040_v27  ;;  %v4006_v30 = vpack.c.bf16 %v624_v28, %v624_v28  ;;  %v4038_v31 = vpack.c.bf16 %v913_v29, %v913_v29 }
 0x15b   : > { %v4330_v32 = vpop.f32.mrf.mxu0  ;;  %v4378_v33 = vpop.f32.mrf.mxu1 }
 0x15c   : > { %1120 = vst [vmem:[#allocation2 + $0x80] sm:$0xf] %v4006_v30  ;;  %1280 = vst [vmem:[#allocation2 + $0x84] sm:$0xf] %v4038_v31  ;;  %v4009_v34 = vpack.c.bf16 %v4330_v32, %v4330_v32  ;;  %v4041_v35 = vpack.c.bf16 %v4378_v33, %v4378_v33 }
 0x15d   : > { %v627_v36 = vpop.f32.mrf.mxu0  ;;  %v916_v37 = vpop.f32.mrf.mxu1 }
 0x15e   : > { %1123 = vst [vmem:[#allocation2 + $0x98] sm:$0xf] %v4009_v34  ;;  %1283 = vst [vmem:[#allocation2 + $0x9c] sm:$0xf] %v4041_v35  ;;  %v4007_v38 = vpack.c.bf16 %v627_v36, %v627_v36  ;;  %v4039_v39 = vpack.c.bf16 %v916_v37, %v916_v37 }
 0x15f   : > { %v4333_v40 = vpop.f32.mrf.mxu0  ;;  %v4381_v41 = vpop.f32.mrf.mxu1 }
 0x160   : > { %1121 = vst [vmem:[#allocation2 + $0x88] sm:$0xf] %v4007_v38  ;;  %1281 = vst [vmem:[#allocation2 + $0x8c] sm:$0xf] %v4039_v39  ;;  %v4012_v42 = vpack.c.bf16 %v4333_v40, %v4333_v40  ;;  %v4044_v43 = vpack.c.bf16 %v4381_v41, %v4381_v41 }
 0x161   : > { %v640_v44 = vpop.f32.mrf.mxu0  ;;  %v929_v45 = vpop.f32.mrf.mxu1 }
 0x162   : > { %1126 = vst [vmem:[#allocation2 + $0xb0] sm:$0xf] %v4012_v42  ;;  %1286 = vst [vmem:[#allocation2 + $0xb4] sm:$0xf] %v4044_v43  ;;  %v4010_v46 = vpack.c.bf16 %v640_v44, %v640_v44  ;;  %v4042_v47 = vpack.c.bf16 %v929_v45, %v929_v45 }
 0x163   : > { %v4334_v48 = vpop.f32.mrf.mxu0  ;;  %v4382_v49 = vpop.f32.mrf.mxu1 }
 0x164   : > { %1124 = vst [vmem:[#allocation2 + $0xa0] sm:$0xf] %v4010_v46  ;;  %1284 = vst [vmem:[#allocation2 + $0xa4] sm:$0xf] %v4042_v47  ;;  %v4013_v50 = vpack.c.bf16 %v4334_v48, %v4334_v48  ;;  %v4045_v51 = vpack.c.bf16 %v4382_v49, %v4382_v49 }
 0x165   : > { %v643_v52 = vpop.f32.mrf.mxu0  ;;  %v932_v53 = vpop.f32.mrf.mxu1 }
 0x166   : > { %1127 = vst [vmem:[#allocation2 + $0xb8] sm:$0xf] %v4013_v50  ;;  %1287 = vst [vmem:[#allocation2 + $0xbc] sm:$0xf] %v4045_v51  ;;  %v4011_v54 = vpack.c.bf16 %v643_v52, %v643_v52  ;;  %v4043_v55 = vpack.c.bf16 %v932_v53, %v932_v53 }
 0x167   : > { %v4337_v56 = vpop.f32.mrf.mxu0  ;;  %v4385_v57 = vpop.f32.mrf.mxu1 }
 0x168   : > { %1125 = vst [vmem:[#allocation2 + $0xa8] sm:$0xf] %v4011_v54  ;;  %1285 = vst [vmem:[#allocation2 + $0xac] sm:$0xf] %v4043_v55  ;;  %v4016_v58 = vpack.c.bf16 %v4337_v56, %v4337_v56  ;;  %v4048_v59 = vpack.c.bf16 %v4385_v57, %v4385_v57 }
 0x169   : > { %v656_v60 = vpop.f32.mrf.mxu0  ;;  %v945_v61 = vpop.f32.mrf.mxu1 }
 0x16a   : > { %1130 = vst [vmem:[#allocation2 + $0xd0] sm:$0xf] %v4016_v58  ;;  %1290 = vst [vmem:[#allocation2 + $0xd4] sm:$0xf] %v4048_v59  ;;  %v4014_v62 = vpack.c.bf16 %v656_v60, %v656_v60  ;;  %v4046_v63 = vpack.c.bf16 %v945_v61, %v945_v61 }
 0x16b   : > { %v4338_v16 = vpop.f32.mrf.mxu0  ;;  %v4386_v17 = vpop.f32.mrf.mxu1 }
 0x16c   : > { %1128 = vst [vmem:[#allocation2 + $0xc0] sm:$0xf] %v4014_v62  ;;  %1288 = vst [vmem:[#allocation2 + $0xc4] sm:$0xf] %v4046_v63  ;;  %v4017_v18 = vpack.c.bf16 %v4338_v16, %v4338_v16  ;;  %v4049_v19 = vpack.c.bf16 %v4386_v17, %v4386_v17 }
 0x16d   : > { %v659_v20 = vpop.f32.mrf.mxu0  ;;  %v948_v21 = vpop.f32.mrf.mxu1 }
 0x16e   : > { %1131 = vst [vmem:[#allocation2 + $0xd8] sm:$0xf] %v4017_v18  ;;  %1291 = vst [vmem:[#allocation2 + $0xdc] sm:$0xf] %v4049_v19  ;;  %v4015_v22 = vpack.c.bf16 %v659_v20, %v659_v20  ;;  %v4047_v23 = vpack.c.bf16 %v948_v21, %v948_v21 }
 0x16f   : > { %v4341_v24 = vpop.f32.mrf.mxu0  ;;  %v4389_v25 = vpop.f32.mrf.mxu1 }
 0x170   : > { %1129 = vst [vmem:[#allocation2 + $0xc8] sm:$0xf] %v4015_v22  ;;  %1289 = vst [vmem:[#allocation2 + $0xcc] sm:$0xf] %v4047_v23  ;;  %v4020_v26 = vpack.c.bf16 %v4341_v24, %v4341_v24  ;;  %v4052_v27 = vpack.c.bf16 %v4389_v25, %v4389_v25 }
 0x171   : > { %v672_v28 = vpop.f32.mrf.mxu0  ;;  %v961_v29 = vpop.f32.mrf.mxu1 }
 0x172   : > { %1134 = vst [vmem:[#allocation2 + $0xf0] sm:$0xf] %v4020_v26  ;;  %1294 = vst [vmem:[#allocation2 + $0xf4] sm:$0xf] %v4052_v27  ;;  %v4018_v30 = vpack.c.bf16 %v672_v28, %v672_v28  ;;  %v4050_v31 = vpack.c.bf16 %v961_v29, %v961_v29 }
 0x173   : > { %v4342_v32 = vpop.f32.mrf.mxu0  ;;  %v4390_v33 = vpop.f32.mrf.mxu1 }
 0x174   : > { %1132 = vst [vmem:[#allocation2 + $0xe0] sm:$0xf] %v4018_v30  ;;  %1292 = vst [vmem:[#allocation2 + $0xe4] sm:$0xf] %v4050_v31  ;;  %v4021_v34 = vpack.c.bf16 %v4342_v32, %v4342_v32  ;;  %v4053_v35 = vpack.c.bf16 %v4390_v33, %v4390_v33 }
 0x175   : > { %v675_v36 = vpop.f32.mrf.mxu0  ;;  %v964_v37 = vpop.f32.mrf.mxu1 }
 0x176   : > { %1135 = vst [vmem:[#allocation2 + $0xf8] sm:$0xf] %v4021_v34  ;;  %1295 = vst [vmem:[#allocation2 + $0xfc] sm:$0xf] %v4053_v35  ;;  %v4019_v38 = vpack.c.bf16 %v675_v36, %v675_v36  ;;  %v4051_v39 = vpack.c.bf16 %v964_v37, %v964_v37 }
 0x178   : > { %1133 = vst [vmem:[#allocation2 + $0xe8] sm:$0xf] %v4019_v38  ;;  %1293 = vst [vmem:[#allocation2 + $0xec] sm:$0xf] %v4051_v39 }
 0x179 PF: > { %p3776_p11 = scmp.le.s32.totalorder %s4979_s27, 0 }
 0x17b   : > { %1299 = sbr.rel (%p3776_p11) target bundleno = 676 (0x2a4), region = 64 }
 0x180   : > { %v3800_v40 = vcombine.low %v5192_v14, %v5194_v15  ;;  %v3799_v41 = vcombine.low %v5188_v12, %v5190_v13  ;;  %v4669_v42 = vld [vmem:[#allocation3] ss:$8 sps:$4 sm:$0xff]   ;;  %v4670_v43 = vld [vmem:[#allocation3 + $0x4] ss:$8 sps:$4 sm:$0xff]   ;;  %v3798_v44 = vcombine.low %v5184_v10, %v5186_v11  ;;  %v3797_v12 = vcombine.low %v5180_v8, %v5182_v9  ;;  %v4683_v46 = vld [vmem:[#allocation3 + $0x70] ss:$8 sps:$4 sm:$0xff]  }
 0x181   : > { %4407 = vmatprep.mubr.bf16.mxu0 %v4669_v42  ;;  %4455 = vmatprep.mubr.bf16.mxu1 %v4670_v43  ;;  %v3796_v13 = vcombine.low %v5176_v6, %v5178_v7  ;;  %v3795_v10 = vcombine.low %v5172_v4, %v5174_v5  ;;  %v3794_v8 = vcombine.low %v5168_v2, %v5170_v3  ;;  %v4671_v7 = vld [vmem:[#allocation3 + $0x10] ss:$8 sps:$4 sm:$0xff]   ;;  %v4672_v4 = vld [vmem:[#allocation3 + $0x14] ss:$8 sps:$4 sm:$0xff]   ;;  %v4673_v5 = vld [vmem:[#allocation3 + $0x20] ss:$8 sps:$4 sm:$0xff]  }
 0x182   : > { %4391 = vmatprep.subr.bf16.mxu0 %v3800_v40  ;;  %4439 = vmatprep.subr.bf16.mxu1 %v3800_v40  ;;  %v3793_v6 = vcombine.low %v5164_v0, %v5166_v1  ;;  %v4674_v9 = vld [vmem:[#allocation3 + $0x24] ss:$8 sps:$4 sm:$0xff]   ;;  %v4675_v2 = vld [vmem:[#allocation3 + $0x30] ss:$8 sps:$4 sm:$0xff]   ;;  %v4676_v3 = vld [vmem:[#allocation3 + $0x34] ss:$8 sps:$4 sm:$0xff]  }
 0x183   : > { %4392 = vmatpush3.bf16.msra.mxu0 %v3800_v40  ;;  %4440 = vmatpush3.bf16.msra.mxu1 %v3800_v40  ;;  %v4677_v11 = vld [vmem:[#allocation3 + $0x40] ss:$8 sps:$4 sm:$0xff]   ;;  %v4678_v14 = vld [vmem:[#allocation3 + $0x44] ss:$8 sps:$4 sm:$0xff]   ;;  %v4679_v0 = vld [vmem:[#allocation3 + $0x50] ss:$8 sps:$4 sm:$0xff]  }
 0x184   : > { %4393 = vmatprep.subr.bf16.mxu0 %v3799_v41  ;;  %4441 = vmatprep.subr.bf16.mxu1 %v3799_v41  ;;  %v4680_v1 = vld [vmem:[#allocation3 + $0x54] ss:$8 sps:$4 sm:$0xff]   ;;  %v4681_v15 = vld [vmem:[#allocation3 + $0x60] ss:$8 sps:$4 sm:$0xff]   ;;  %v4682_v45 = vld [vmem:[#allocation3 + $0x64] ss:$8 sps:$4 sm:$0xff]  }
 0x185   : > { %v4684_v47 = vld [vmem:[#allocation3 + $0x74] ss:$8 sps:$4 sm:$0xff]   ;;  %v4685_v48 = vld [vmem:[#allocation3 + $0x80] ss:$8 sps:$4 sm:$0xff]   ;;  %v4686_v49 = vld [vmem:[#allocation3 + $0x84] ss:$8 sps:$4 sm:$0xff]  }
 0x186   : > { %v4687_v50 = vld [vmem:[#allocation3 + $0x90] ss:$8 sps:$4 sm:$0xff]   ;;  %v4688_v51 = vld [vmem:[#allocation3 + $0x94] ss:$8 sps:$4 sm:$0xff]   ;;  %v4689_v52 = vld [vmem:[#allocation3 + $0xa0] ss:$8 sps:$4 sm:$0xff]  }
 0x187   : > { %4394 = vmatpush3.bf16.msra.mxu0 %v3799_v41  ;;  %4442 = vmatpush3.bf16.msra.mxu1 %v3799_v41  ;;  %v4690_v53 = vld [vmem:[#allocation3 + $0xa4] ss:$8 sps:$4 sm:$0xff]   ;;  %v4691_v54 = vld [vmem:[#allocation3 + $0xb0] ss:$8 sps:$4 sm:$0xff]   ;;  %v4692_v55 = vld [vmem:[#allocation3 + $0xb4] ss:$8 sps:$4 sm:$0xff]  }
 0x188   : > { %4395 = vmatprep.subr.bf16.mxu0 %v3798_v44  ;;  %4443 = vmatprep.subr.bf16.mxu1 %v3798_v44  ;;  %v4693_v56 = vld [vmem:[#allocation3 + $0xc0] ss:$8 sps:$4 sm:$0xff]   ;;  %v4694_v57 = vld [vmem:[#allocation3 + $0xc4] ss:$8 sps:$4 sm:$0xff]   ;;  %v4695_v58 = vld [vmem:[#allocation3 + $0xd0] ss:$8 sps:$4 sm:$0xff]  }
 0x189   : > { %v4696_v59 = vld [vmem:[#allocation3 + $0xd4] ss:$8 sps:$4 sm:$0xff]   ;;  %v4697_v60 = vld [vmem:[#allocation3 + $0xe0] ss:$8 sps:$4 sm:$0xff]   ;;  %v4698_v61 = vld [vmem:[#allocation3 + $0xe4] ss:$8 sps:$4 sm:$0xff]  }
 0x18a   : > { %v4699_v62 = vld [vmem:[#allocation3 + $0xf0] ss:$8 sps:$4 sm:$0xff]   ;;  %v4700_v63 = vld [vmem:[#allocation3 + $0xf4] ss:$8 sps:$4 sm:$0xff]  }
 0x18b   : > { %4396 = vmatpush3.bf16.msra.mxu0 %v3798_v44  ;;  %4444 = vmatpush3.bf16.msra.mxu1 %v3798_v44 }
 0x18c   : > { %4397 = vmatprep.subr.bf16.mxu0 %v3797_v12  ;;  %4445 = vmatprep.subr.bf16.mxu1 %v3797_v12 }
 0x18f   : > { %4398 = vmatpush3.bf16.msra.mxu0 %v3797_v12  ;;  %4446 = vmatpush3.bf16.msra.mxu1 %v3797_v12 }
 0x190   : > { %4399 = vmatprep.subr.bf16.mxu0 %v3796_v13  ;;  %4447 = vmatprep.subr.bf16.mxu1 %v3796_v13 }
 0x193   : > { %4400 = vmatpush3.bf16.msra.mxu0 %v3796_v13  ;;  %4448 = vmatpush3.bf16.msra.mxu1 %v3796_v13 }
 0x194   : > { %4401 = vmatprep.subr.bf16.mxu0 %v3795_v10  ;;  %4449 = vmatprep.subr.bf16.mxu1 %v3795_v10 }
 0x197   : > { %4402 = vmatpush3.bf16.msra.mxu0 %v3795_v10  ;;  %4450 = vmatpush3.bf16.msra.mxu1 %v3795_v10 }
 0x198   : > { %4403 = vmatprep.subr.bf16.mxu0 %v3794_v8  ;;  %4451 = vmatprep.subr.bf16.mxu1 %v3794_v8 }
 0x19b   : > { %4404 = vmatpush3.bf16.msra.mxu0 %v3794_v8  ;;  %4452 = vmatpush3.bf16.msra.mxu1 %v3794_v8 }
 0x19c   : > { %4405 = vmatprep.subr.bf16.mxu0 %v3793_v6  ;;  %4453 = vmatprep.subr.bf16.mxu1 %v3793_v6 }
 0x19f   : > { %4406 = vmatpush3.bf16.msra.mxu0 %v3793_v6  ;;  %4454 = vmatpush3.bf16.msra.mxu1 %v3793_v6 }
 0x1a2   : > { %4408 = vmatmul.mubr.bf16.vlgmr.msra.gmra.mxu0 %v4671_v7  ;;  %4456 = vmatmul.mubr.bf16.vlgmr.msra.gmra.mxu1 %v4672_v4 }
 0x1a3   : > { %4411 = vmatprep.mubr.bf16.mxu0 %v4673_v5  ;;  %4459 = vmatprep.mubr.bf16.mxu1 %v4674_v9 }
 0x1aa   : > { %4412 = vmatmul.mubr.bf16.gmra.mxu0 %v4675_v2  ;;  %4460 = vmatmul.mubr.bf16.gmra.mxu1 %v4676_v3 }
 0x1ab   : > { %4415 = vmatprep.mubr.bf16.mxu0 %v4677_v11  ;;  %4463 = vmatprep.mubr.bf16.mxu1 %v4678_v14 }
 0x1b2   : > { %4416 = vmatmul.mubr.bf16.gmra.mxu0 %v4679_v0  ;;  %4464 = vmatmul.mubr.bf16.gmra.mxu1 %v4680_v1 }
 0x1b3   : > { %4419 = vmatprep.mubr.bf16.mxu0 %v4681_v15  ;;  %4467 = vmatprep.mubr.bf16.mxu1 %v4682_v45 }
 0x1ba   : > { %4420 = vmatmul.mubr.bf16.gmra.mxu0 %v4683_v46  ;;  %4468 = vmatmul.mubr.bf16.gmra.mxu1 %v4684_v47 }
 0x1bb   : > { %4423 = vmatprep.mubr.bf16.mxu0 %v4685_v48  ;;  %4471 = vmatprep.mubr.bf16.mxu1 %v4686_v49 }
 0x1c2   : > { %4424 = vmatmul.mubr.bf16.gmra.mxu0 %v4687_v50  ;;  %4472 = vmatmul.mubr.bf16.gmra.mxu1 %v4688_v51 }
 0x1c3   : > { %4427 = vmatprep.mubr.bf16.mxu0 %v4689_v52  ;;  %4475 = vmatprep.mubr.bf16.mxu1 %v4690_v53 }
 0x1ca   : > { %4428 = vmatmul.mubr.bf16.gmra.mxu0 %v4691_v54  ;;  %4476 = vmatmul.mubr.bf16.gmra.mxu1 %v4692_v55 }
 0x1cb   : > { %4431 = vmatprep.mubr.bf16.mxu0 %v4693_v56  ;;  %4479 = vmatprep.mubr.bf16.mxu1 %v4694_v57 }
 0x1d2   : > { %4432 = vmatmul.mubr.bf16.gmra.mxu0 %v4695_v58  ;;  %4480 = vmatmul.mubr.bf16.gmra.mxu1 %v4696_v59 }
 0x1d3   : > { %4435 = vmatprep.mubr.bf16.mxu0 %v4697_v60  ;;  %4483 = vmatprep.mubr.bf16.mxu1 %v4698_v61 }
 0x1da   : > { %4436 = vmatmul.mubr.bf16.gmra.mxu0 %v4699_v62  ;;  %4484 = vmatmul.mubr.bf16.gmra.mxu1 %v4700_v63 }
 0x262   : > { %v4409_v16 = vpop.f32.mrf.mxu0  ;;  %v4457_v17 = vpop.f32.mrf.mxu1 }
 0x263   : > { %v4056_v18 = vpack.c.bf16 %v4409_v16, %v4409_v16  ;;  %v4088_v19 = vpack.c.bf16 %v4457_v17, %v4457_v17 }
 0x264   : > { %v1510_v20 = vpop.f32.mrf.mxu0  ;;  %v1799_v21 = vpop.f32.mrf.mxu1 }
 0x265   : > { %2056 = vst [vmem:[#allocation2 + $0x10] sm:$0xf] %v4056_v18  ;;  %2216 = vst [vmem:[#allocation2 + $0x14] sm:$0xf] %v4088_v19  ;;  %v4054_v22 = vpack.c.bf16 %v1510_v20, %v1510_v20  ;;  %v4086_v23 = vpack.c.bf16 %v1799_v21, %v1799_v21 }
 0x266   : > { %v4410_v24 = vpop.f32.mrf.mxu0  ;;  %v4458_v25 = vpop.f32.mrf.mxu1 }
 0x267   : > { %2054 = vst [vmem:[#allocation2] sm:$0xf] %v4054_v22  ;;  %2214 = vst [vmem:[#allocation2 + $0x4] sm:$0xf] %v4086_v23  ;;  %v4057_v26 = vpack.c.bf16 %v4410_v24, %v4410_v24  ;;  %v4089_v27 = vpack.c.bf16 %v4458_v25, %v4458_v25 }
 0x268   : > { %v1513_v28 = vpop.f32.mrf.mxu0  ;;  %v1802_v29 = vpop.f32.mrf.mxu1 }
 0x269   : > { %2057 = vst [vmem:[#allocation2 + $0x18] sm:$0xf] %v4057_v26  ;;  %2217 = vst [vmem:[#allocation2 + $0x1c] sm:$0xf] %v4089_v27  ;;  %v4055_v30 = vpack.c.bf16 %v1513_v28, %v1513_v28  ;;  %v4087_v31 = vpack.c.bf16 %v1802_v29, %v1802_v29 }
 0x26a   : > { %v4413_v32 = vpop.f32.mrf.mxu0  ;;  %v4461_v33 = vpop.f32.mrf.mxu1 }
 0x26b   : > { %2055 = vst [vmem:[#allocation2 + $0x8] sm:$0xf] %v4055_v30  ;;  %2215 = vst [vmem:[#allocation2 + $0xc] sm:$0xf] %v4087_v31  ;;  %v4060_v34 = vpack.c.bf16 %v4413_v32, %v4413_v32  ;;  %v4092_v35 = vpack.c.bf16 %v4461_v33, %v4461_v33 }
 0x26c   : > { %v1526_v36 = vpop.f32.mrf.mxu0  ;;  %v1815_v37 = vpop.f32.mrf.mxu1 }
 0x26d   : > { %2060 = vst [vmem:[#allocation2 + $0x30] sm:$0xf] %v4060_v34  ;;  %2220 = vst [vmem:[#allocation2 + $0x34] sm:$0xf] %v4092_v35  ;;  %v4058_v38 = vpack.c.bf16 %v1526_v36, %v1526_v36  ;;  %v4090_v39 = vpack.c.bf16 %v1815_v37, %v1815_v37 }
 0x26e   : > { %v4414_v40 = vpop.f32.mrf.mxu0  ;;  %v4462_v41 = vpop.f32.mrf.mxu1 }
 0x26f   : > { %2058 = vst [vmem:[#allocation2 + $0x20] sm:$0xf] %v4058_v38  ;;  %2218 = vst [vmem:[#allocation2 + $0x24] sm:$0xf] %v4090_v39  ;;  %v4061_v42 = vpack.c.bf16 %v4414_v40, %v4414_v40  ;;  %v4093_v43 = vpack.c.bf16 %v4462_v41, %v4462_v41 }
 0x270   : > { %v1529_v44 = vpop.f32.mrf.mxu0  ;;  %v1818_v12 = vpop.f32.mrf.mxu1 }
 0x271   : > { %2061 = vst [vmem:[#allocation2 + $0x38] sm:$0xf] %v4061_v42  ;;  %2221 = vst [vmem:[#allocation2 + $0x3c] sm:$0xf] %v4093_v43  ;;  %v4059_v13 = vpack.c.bf16 %v1529_v44, %v1529_v44  ;;  %v4091_v10 = vpack.c.bf16 %v1818_v12, %v1818_v12 }
 0x272   : > { %v4417_v8 = vpop.f32.mrf.mxu0  ;;  %v4465_v6 = vpop.f32.mrf.mxu1 }
 0x273   : > { %2059 = vst [vmem:[#allocation2 + $0x28] sm:$0xf] %v4059_v13  ;;  %2219 = vst [vmem:[#allocation2 + $0x2c] sm:$0xf] %v4091_v10  ;;  %v4064_v7 = vpack.c.bf16 %v4417_v8, %v4417_v8  ;;  %v4096_v4 = vpack.c.bf16 %v4465_v6, %v4465_v6 }
 0x274   : > { %v1542_v5 = vpop.f32.mrf.mxu0  ;;  %v1831_v9 = vpop.f32.mrf.mxu1 }
 0x275   : > { %2064 = vst [vmem:[#allocation2 + $0x50] sm:$0xf] %v4064_v7  ;;  %2224 = vst [vmem:[#allocation2 + $0x54] sm:$0xf] %v4096_v4  ;;  %v4062_v2 = vpack.c.bf16 %v1542_v5, %v1542_v5  ;;  %v4094_v3 = vpack.c.bf16 %v1831_v9, %v1831_v9 }
 0x276   : > { %v4418_v11 = vpop.f32.mrf.mxu0  ;;  %v4466_v14 = vpop.f32.mrf.mxu1 }
 0x277   : > { %2062 = vst [vmem:[#allocation2 + $0x40] sm:$0xf] %v4062_v2  ;;  %2222 = vst [vmem:[#allocation2 + $0x44] sm:$0xf] %v4094_v3  ;;  %v4065_v0 = vpack.c.bf16 %v4418_v11, %v4418_v11  ;;  %v4097_v1 = vpack.c.bf16 %v4466_v14, %v4466_v14 }
 0x278   : > { %v1545_v15 = vpop.f32.mrf.mxu0  ;;  %v1834_v45 = vpop.f32.mrf.mxu1 }
 0x279   : > { %2065 = vst [vmem:[#allocation2 + $0x58] sm:$0xf] %v4065_v0  ;;  %2225 = vst [vmem:[#allocation2 + $0x5c] sm:$0xf] %v4097_v1  ;;  %v4063_v46 = vpack.c.bf16 %v1545_v15, %v1545_v15  ;;  %v4095_v47 = vpack.c.bf16 %v1834_v45, %v1834_v45 }
 0x27a   : > { %v4421_v48 = vpop.f32.mrf.mxu0  ;;  %v4469_v49 = vpop.f32.mrf.mxu1 }
 0x27b   : > { %2063 = vst [vmem:[#allocation2 + $0x48] sm:$0xf] %v4063_v46  ;;  %2223 = vst [vmem:[#allocation2 + $0x4c] sm:$0xf] %v4095_v47  ;;  %v4068_v50 = vpack.c.bf16 %v4421_v48, %v4421_v48  ;;  %v4100_v51 = vpack.c.bf16 %v4469_v49, %v4469_v49 }
 0x27c   : > { %v1558_v52 = vpop.f32.mrf.mxu0  ;;  %v1847_v53 = vpop.f32.mrf.mxu1 }
 0x27d   : > { %2068 = vst [vmem:[#allocation2 + $0x70] sm:$0xf] %v4068_v50  ;;  %2228 = vst [vmem:[#allocation2 + $0x74] sm:$0xf] %v4100_v51  ;;  %v4066_v54 = vpack.c.bf16 %v1558_v52, %v1558_v52  ;;  %v4098_v55 = vpack.c.bf16 %v1847_v53, %v1847_v53 }
 0x27e   : > { %v4422_v56 = vpop.f32.mrf.mxu0  ;;  %v4470_v57 = vpop.f32.mrf.mxu1 }
 0x27f   : > { %2066 = vst [vmem:[#allocation2 + $0x60] sm:$0xf] %v4066_v54  ;;  %2226 = vst [vmem:[#allocation2 + $0x64] sm:$0xf] %v4098_v55  ;;  %v4069_v58 = vpack.c.bf16 %v4422_v56, %v4422_v56  ;;  %v4101_v59 = vpack.c.bf16 %v4470_v57, %v4470_v57 }
 0x280   : > { %v1561_v60 = vpop.f32.mrf.mxu0  ;;  %v1850_v61 = vpop.f32.mrf.mxu1 }
 0x281   : > { %2069 = vst [vmem:[#allocation2 + $0x78] sm:$0xf] %v4069_v58  ;;  %2229 = vst [vmem:[#allocation2 + $0x7c] sm:$0xf] %v4101_v59  ;;  %v4067_v62 = vpack.c.bf16 %v1561_v60, %v1561_v60  ;;  %v4099_v63 = vpack.c.bf16 %v1850_v61, %v1850_v61 }
 0x282   : > { %v4425_v16 = vpop.f32.mrf.mxu0  ;;  %v4473_v17 = vpop.f32.mrf.mxu1 }
 0x283   : > { %2067 = vst [vmem:[#allocation2 + $0x68] sm:$0xf] %v4067_v62  ;;  %2227 = vst [vmem:[#allocation2 + $0x6c] sm:$0xf] %v4099_v63  ;;  %v4072_v18 = vpack.c.bf16 %v4425_v16, %v4425_v16  ;;  %v4104_v19 = vpack.c.bf16 %v4473_v17, %v4473_v17 }
 0x284   : > { %v1574_v20 = vpop.f32.mrf.mxu0  ;;  %v1863_v21 = vpop.f32.mrf.mxu1 }
 0x285   : > { %2072 = vst [vmem:[#allocation2 + $0x90] sm:$0xf] %v4072_v18  ;;  %2232 = vst [vmem:[#allocation2 + $0x94] sm:$0xf] %v4104_v19  ;;  %v4070_v22 = vpack.c.bf16 %v1574_v20, %v1574_v20  ;;  %v4102_v23 = vpack.c.bf16 %v1863_v21, %v1863_v21 }
 0x286   : > { %v4426_v24 = vpop.f32.mrf.mxu0  ;;  %v4474_v25 = vpop.f32.mrf.mxu1 }
 0x287   : > { %2070 = vst [vmem:[#allocation2 + $0x80] sm:$0xf] %v4070_v22  ;;  %2230 = vst [vmem:[#allocation2 + $0x84] sm:$0xf] %v4102_v23  ;;  %v4073_v26 = vpack.c.bf16 %v4426_v24, %v4426_v24  ;;  %v4105_v27 = vpack.c.bf16 %v4474_v25, %v4474_v25 }
 0x288   : > { %v1577_v28 = vpop.f32.mrf.mxu0  ;;  %v1866_v29 = vpop.f32.mrf.mxu1 }
 0x289   : > { %2073 = vst [vmem:[#allocation2 + $0x98] sm:$0xf] %v4073_v26  ;;  %2233 = vst [vmem:[#allocation2 + $0x9c] sm:$0xf] %v4105_v27  ;;  %v4071_v30 = vpack.c.bf16 %v1577_v28, %v1577_v28  ;;  %v4103_v31 = vpack.c.bf16 %v1866_v29, %v1866_v29 }
 0x28a   : > { %v4429_v32 = vpop.f32.mrf.mxu0  ;;  %v4477_v33 = vpop.f32.mrf.mxu1 }
 0x28b   : > { %2071 = vst [vmem:[#allocation2 + $0x88] sm:$0xf] %v4071_v30  ;;  %2231 = vst [vmem:[#allocation2 + $0x8c] sm:$0xf] %v4103_v31  ;;  %v4076_v34 = vpack.c.bf16 %v4429_v32, %v4429_v32  ;;  %v4108_v35 = vpack.c.bf16 %v4477_v33, %v4477_v33 }
 0x28c   : > { %v1590_v36 = vpop.f32.mrf.mxu0  ;;  %v1879_v37 = vpop.f32.mrf.mxu1 }
 0x28d   : > { %2076 = vst [vmem:[#allocation2 + $0xb0] sm:$0xf] %v4076_v34  ;;  %2236 = vst [vmem:[#allocation2 + $0xb4] sm:$0xf] %v4108_v35  ;;  %v4074_v38 = vpack.c.bf16 %v1590_v36, %v1590_v36  ;;  %v4106_v39 = vpack.c.bf16 %v1879_v37, %v1879_v37 }
 0x28e   : > { %v4430_v40 = vpop.f32.mrf.mxu0  ;;  %v4478_v41 = vpop.f32.mrf.mxu1 }
 0x28f   : > { %2074 = vst [vmem:[#allocation2 + $0xa0] sm:$0xf] %v4074_v38  ;;  %2234 = vst [vmem:[#allocation2 + $0xa4] sm:$0xf] %v4106_v39  ;;  %v4077_v42 = vpack.c.bf16 %v4430_v40, %v4430_v40  ;;  %v4109_v43 = vpack.c.bf16 %v4478_v41, %v4478_v41 }
 0x290   : > { %v1593_v44 = vpop.f32.mrf.mxu0  ;;  %v1882_v12 = vpop.f32.mrf.mxu1 }
 0x291   : > { %2077 = vst [vmem:[#allocation2 + $0xb8] sm:$0xf] %v4077_v42  ;;  %2237 = vst [vmem:[#allocation2 + $0xbc] sm:$0xf] %v4109_v43  ;;  %v4075_v13 = vpack.c.bf16 %v1593_v44, %v1593_v44  ;;  %v4107_v10 = vpack.c.bf16 %v1882_v12, %v1882_v12 }
 0x292   : > { %v4433_v8 = vpop.f32.mrf.mxu0  ;;  %v4481_v6 = vpop.f32.mrf.mxu1 }
 0x293   : > { %2075 = vst [vmem:[#allocation2 + $0xa8] sm:$0xf] %v4075_v13  ;;  %2235 = vst [vmem:[#allocation2 + $0xac] sm:$0xf] %v4107_v10  ;;  %v4080_v7 = vpack.c.bf16 %v4433_v8, %v4433_v8  ;;  %v4112_v4 = vpack.c.bf16 %v4481_v6, %v4481_v6 }
 0x294   : > { %v1606_v5 = vpop.f32.mrf.mxu0  ;;  %v1895_v9 = vpop.f32.mrf.mxu1 }
 0x295   : > { %2080 = vst [vmem:[#allocation2 + $0xd0] sm:$0xf] %v4080_v7  ;;  %2240 = vst [vmem:[#allocation2 + $0xd4] sm:$0xf] %v4112_v4  ;;  %v4078_v2 = vpack.c.bf16 %v1606_v5, %v1606_v5  ;;  %v4110_v3 = vpack.c.bf16 %v1895_v9, %v1895_v9 }
 0x296   : > { %v4434_v11 = vpop.f32.mrf.mxu0  ;;  %v4482_v14 = vpop.f32.mrf.mxu1 }
 0x297   : > { %2078 = vst [vmem:[#allocation2 + $0xc0] sm:$0xf] %v4078_v2  ;;  %2238 = vst [vmem:[#allocation2 + $0xc4] sm:$0xf] %v4110_v3  ;;  %v4081_v0 = vpack.c.bf16 %v4434_v11, %v4434_v11  ;;  %v4113_v1 = vpack.c.bf16 %v4482_v14, %v4482_v14 }
 0x298   : > { %v1609_v15 = vpop.f32.mrf.mxu0  ;;  %v1898_v45 = vpop.f32.mrf.mxu1 }
 0x299   : > { %2081 = vst [vmem:[#allocation2 + $0xd8] sm:$0xf] %v4081_v0  ;;  %2241 = vst [vmem:[#allocation2 + $0xdc] sm:$0xf] %v4113_v1  ;;  %v4079_v46 = vpack.c.bf16 %v1609_v15, %v1609_v15  ;;  %v4111_v47 = vpack.c.bf16 %v1898_v45, %v1898_v45 }
 0x29a   : > { %v4437_v48 = vpop.f32.mrf.mxu0  ;;  %v4485_v49 = vpop.f32.mrf.mxu1 }
 0x29b   : > { %2079 = vst [vmem:[#allocation2 + $0xc8] sm:$0xf] %v4079_v46  ;;  %2239 = vst [vmem:[#allocation2 + $0xcc] sm:$0xf] %v4111_v47  ;;  %v4084_v50 = vpack.c.bf16 %v4437_v48, %v4437_v48  ;;  %v4116_v51 = vpack.c.bf16 %v4485_v49, %v4485_v49 }
 0x29c   : > { %v1622_v52 = vpop.f32.mrf.mxu0  ;;  %v1911_v53 = vpop.f32.mrf.mxu1 }
 0x29d   : > { %2084 = vst [vmem:[#allocation2 + $0xf0] sm:$0xf] %v4084_v50  ;;  %2244 = vst [vmem:[#allocation2 + $0xf4] sm:$0xf] %v4116_v51  ;;  %v4082_v54 = vpack.c.bf16 %v1622_v52, %v1622_v52  ;;  %v4114_v55 = vpack.c.bf16 %v1911_v53, %v1911_v53 }
 0x29e   : > { %v4438_v56 = vpop.f32.mrf.mxu0  ;;  %v4486_v57 = vpop.f32.mrf.mxu1 }
 0x29f   : > { %2082 = vst [vmem:[#allocation2 + $0xe0] sm:$0xf] %v4082_v54  ;;  %2242 = vst [vmem:[#allocation2 + $0xe4] sm:$0xf] %v4114_v55  ;;  %v4085_v58 = vpack.c.bf16 %v4438_v56, %v4438_v56  ;;  %v4117_v59 = vpack.c.bf16 %v4486_v57, %v4486_v57 }
 0x2a0   : > { %v1625_v60 = vpop.f32.mrf.mxu0  ;;  %v1914_v61 = vpop.f32.mrf.mxu1 }
 0x2a1   : > { %2085 = vst [vmem:[#allocation2 + $0xf8] sm:$0xf] %v4085_v58  ;;  %2245 = vst [vmem:[#allocation2 + $0xfc] sm:$0xf] %v4117_v59  ;;  %v4083_v62 = vpack.c.bf16 %v1625_v60, %v1625_v60  ;;  %v4115_v63 = vpack.c.bf16 %v1914_v61, %v1914_v61 }
 0x2a3   : > { %2083 = vst [vmem:[#allocation2 + $0xe8] sm:$0xf] %v4083_v62  ;;  %2243 = vst [vmem:[#allocation2 + $0xec] sm:$0xf] %v4115_v63 }
 0x2a4 PF: > { %v4701_v16 = vld [vmem:[#allocation2 + $0x74] ss:$8 sps:$4 sm:$0xff]   ;;  %v4703_v17 = vld [vmem:[#allocation2 + $0x70] ss:$8 sps:$4 sm:$0xff]   ;;  %v4704_v18 = vld [vmem:[#allocation2 + $0x64] ss:$8 sps:$4 sm:$0xff]   ;;  %v2296_v48 = vlaneseq }
 0x2a5   : > { %2546 = vmatprep.subr.bf16.mxu0 %v4701_v16  ;;  %4487 = vmatprep.subr.bf16.mxu1 %v4701_v16  ;;  %v4706_v19 = vld [vmem:[#allocation2 + $0x60] ss:$8 sps:$4 sm:$0xff]   ;;  %v4707_v20 = vld [vmem:[#allocation2 + $0x54] ss:$8 sps:$4 sm:$0xff]   ;;  %v4709_v21 = vld [vmem:[#allocation2 + $0x50] ss:$8 sps:$4 sm:$0xff]  }
 0x2a6   : > { %2547 = vmatpush1.bf16.msra.mxu0 %v4703_v17  ;;  %4503 = vmatpush1.bf16.msra.mxu1 %v4703_v17  ;;  %v4710_v22 = vld [vmem:[#allocation2 + $0x44] ss:$8 sps:$4 sm:$0xff]   ;;  %v4712_v23 = vld [vmem:[#allocation2 + $0x40] ss:$8 sps:$4 sm:$0xff]   ;;  %v4713_v24 = vld [vmem:[#allocation2 + $0x34] ss:$8 sps:$4 sm:$0xff]  }
 0x2a7   : > { %2548 = vmatprep.subr.bf16.mxu0 %v4704_v18  ;;  %4488 = vmatprep.subr.bf16.mxu1 %v4704_v18  ;;  %v4715_v25 = vld [vmem:[#allocation2 + $0x30] ss:$8 sps:$4 sm:$0xff]   ;;  %v4716_v26 = vld [vmem:[#allocation2 + $0x24] ss:$8 sps:$4 sm:$0xff]   ;;  %v4718_v27 = vld [vmem:[#allocation2 + $0x20] ss:$8 sps:$4 sm:$0xff]  }
 0x2a8   : > { %v4719_v28 = vld [vmem:[#allocation2 + $0x14] ss:$8 sps:$4 sm:$0xff]   ;;  %v4751_v29 = vld [vmem:[%s5147_s12 + $0x4] ss:$8 sps:$4 sm:$0xff]   ;;  %v4721_v30 = vld [vmem:[#allocation2 + $0x10] ss:$8 sps:$4 sm:$0xff]  }
 0x2a9   : > { %v4754_v31 = vld [vmem:[%s5147_s12 + $0x44] ss:$8 sps:$4 sm:$0xff]   ;;  %2578 = vmatprep.mubr.bf16.mxu0 %v4751_v29  ;;  %v4724_v33 = vld [vmem:[#allocation2] ss:$8 sps:$4 sm:$0xff]   ;;  %v4725_v34 = vld [vmem:[#allocation2 + $0xf4] ss:$8 sps:$4 sm:$0xff]  }
 0x2aa   : > { %2549 = vmatpush1.bf16.msra.mxu0 %v4706_v19  ;;  %4504 = vmatpush1.bf16.msra.mxu1 %v4706_v19  ;;  %v4722_v32 = vld [vmem:[#allocation2 + $0x4] ss:$8 sps:$4 sm:$0xff]   ;;  %v4727_v35 = vld [vmem:[#allocation2 + $0xf0] ss:$8 sps:$4 sm:$0xff]   ;;  %v4730_v37 = vld [vmem:[#allocation2 + $0xe0] ss:$8 sps:$4 sm:$0xff]  }
 0x2ab   : > { %2550 = vmatprep.subr.bf16.mxu0 %v4707_v20  ;;  %4489 = vmatprep.subr.bf16.mxu1 %v4707_v20  ;;  %v4728_v36 = vld [vmem:[#allocation2 + $0xe4] ss:$8 sps:$4 sm:$0xff]   ;;  %v4731_v38 = vld [vmem:[#allocation2 + $0xd4] ss:$8 sps:$4 sm:$0xff]   ;;  %v4733_v39 = vld [vmem:[#allocation2 + $0xd0] ss:$8 sps:$4 sm:$0xff]  }
 0x2ac   : > { %2618 = vmatprep.mubr.bf16.mxu1 %v4754_v31  ;;  %v4734_v40 = vld [vmem:[#allocation2 + $0xc4] ss:$8 sps:$4 sm:$0xff]   ;;  %v4736_v41 = vld [vmem:[#allocation2 + $0xc0] ss:$8 sps:$4 sm:$0xff]   ;;  %v4737_v42 = vld [vmem:[#allocation2 + $0xb4] ss:$8 sps:$4 sm:$0xff]  }
 0x2ad   : > { %v4739_v43 = vld [vmem:[#allocation2 + $0xb0] ss:$8 sps:$4 sm:$0xff]   ;;  %v4740_v44 = vld [vmem:[#allocation2 + $0xa4] ss:$8 sps:$4 sm:$0xff]   ;;  %v4742_v12 = vld [vmem:[#allocation2 + $0xa0] ss:$8 sps:$4 sm:$0xff]  }
 0x2ae   : > { %2551 = vmatpush1.bf16.msra.mxu0 %v4709_v21  ;;  %4505 = vmatpush1.bf16.msra.mxu1 %v4709_v21  ;;  %v4743_v13 = vld [vmem:[#allocation2 + $0x94] ss:$8 sps:$4 sm:$0xff]   ;;  %v4745_v10 = vld [vmem:[#allocation2 + $0x90] ss:$8 sps:$4 sm:$0xff]   ;;  %v4746_v8 = vld [vmem:[#allocation2 + $0x84] ss:$8 sps:$4 sm:$0xff]  }
 0x2af   : > { %2552 = vmatprep.subr.bf16.mxu0 %v4710_v22  ;;  %4490 = vmatprep.subr.bf16.mxu1 %v4710_v22  ;;  %v4748_v6 = vld [vmem:[#allocation2 + $0x80] ss:$8 sps:$4 sm:$0xff]   ;;  %v4755_v5 = vld [vmem:[%s5147_s12 + $0x14] ss:$8 sps:$4 sm:$0xff]   ;;  %v4759_v2 = vld [vmem:[%s5147_s12 + $0x10] ss:$8 sps:$4 sm:$0xff]  }
 0x2b0   : > { %v4749_v7 = vld [vmem:[%s5147_s12] ss:$8 sps:$4 sm:$0xff]   ;;  %v4757_v9 = vld [vmem:[%s5147_s12 + $0x54] ss:$8 sps:$4 sm:$0xff]   ;;  %v4760_v3 = vld [vmem:[%s5147_s12 + $0x50] ss:$8 sps:$4 sm:$0xff]  }
 0x2b1   : > { %v4752_v4 = vld [vmem:[%s5147_s12 + $0x40] ss:$8 sps:$4 sm:$0xff]   ;;  %v4761_v11 = vld [vmem:[%s5147_s12 + $0x24] ss:$8 sps:$4 sm:$0xff]   ;;  %v4767_v15 = vld [vmem:[%s5147_s12 + $0x34] ss:$8 sps:$4 sm:$0xff]  }
 0x2b2   : > { %2553 = vmatpush1.bf16.msra.mxu0 %v4712_v23  ;;  %4506 = vmatpush1.bf16.msra.mxu1 %v4712_v23  ;;  %v4763_v14 = vld [vmem:[%s5147_s12 + $0x64] ss:$8 sps:$4 sm:$0xff]   ;;  %v4765_v0 = vld [vmem:[%s5147_s12 + $0x20] ss:$8 sps:$4 sm:$0xff]   ;;  %v4769_v45 = vld [vmem:[%s5147_s12 + $0x74] ss:$8 sps:$4 sm:$0xff]  }
 0x2b3   : > { %2554 = vmatprep.subr.bf16.mxu0 %v4713_v24  ;;  %4491 = vmatprep.subr.bf16.mxu1 %v4713_v24  ;;  %v4766_v1 = vld [vmem:[%s5147_s12 + $0x60] ss:$8 sps:$4 sm:$0xff]   ;;  %v4771_v46 = vld [vmem:[%s5147_s12 + $0x30] ss:$8 sps:$4 sm:$0xff]   ;;  %v5246_v49 = vshrl.u32 %v2296_v48, 7  ;;  %s3929_s8 = sshll.u32 %s4975_s26, 7 }
 0x2b4   : > { %v4772_v47 = vld [vmem:[%s5147_s12 + $0x70] ss:$8 sps:$4 sm:$0xff]   ;;  %v2294_v51 = vld [vmem:[%s5161_s11] sm:$0x3]  ;;  %s5266_s23 = scalar_lea.vmem [#allocation3], %s3929_s8  ;;  %p3948_p12 = scmp.ne.s32.totalorder %s4979_s27, 1 }
 0x2b5   : > { %v2298_v50 = vsub.s32 0, %v5246_v49  ;;  %v2302_v52 = vsub.s32 1, %v5246_v49  ;;  %s2850_s10 = sld [smem:[#allocation5]] (!%p3948_p12)  ;;  %s4997_s0 = smov (!%p3948_p12), 127  }
 0x2b6   : > { %2555 = vmatpush1.bf16.msra.mxu0 %v4715_v25  ;;  %4507 = vmatpush1.bf16.msra.mxu1 %v4715_v25  ;;  %p4562_p7 = scmp.eq.s32.totalorder (!%p3948_p12), %s4975_s26, 0  ;;  %p4563_p13 = scmp.eq.s32.totalorder (!%p3948_p12), %s4975_s26, 1 }
 0x2b7   : > { %2556 = vmatprep.subr.bf16.mxu0 %v4716_v26  ;;  %4492 = vmatprep.subr.bf16.mxu1 %v4716_v26  ;;  %v5251_v53 = vrot.slane %v2294_v51, %v2298_v50  ;;  %v5253_v54 = vrot.slane %v2294_v51, %v2302_v52 }
 0x2ba   : > { %2557 = vmatpush1.bf16.msra.mxu0 %v4718_v27  ;;  %4508 = vmatpush1.bf16.msra.mxu1 %v4718_v27 }
 0x2bb   : > { %2558 = vmatprep.subr.bf16.mxu0 %v4719_v28  ;;  %4493 = vmatprep.subr.bf16.mxu1 %v4719_v28 }
 0x2be   : > { %2559 = vmatpush1.bf16.msra.mxu0 %v4721_v30  ;;  %4509 = vmatpush1.bf16.msra.mxu1 %v4721_v30 }
 0x2bf   : > { %2560 = vmatprep.subr.bf16.mxu0 %v4722_v32  ;;  %4494 = vmatprep.subr.bf16.mxu1 %v4722_v32 }
 0x2c2   : > { %2561 = vmatpush1.bf16.msra.mxu0 %v4724_v33  ;;  %4510 = vmatpush1.bf16.msra.mxu1 %v4724_v33 }
 0x2c3   : > { %2562 = vmatprep.subr.bf16.mxu0 %v4725_v34  ;;  %4495 = vmatprep.subr.bf16.mxu1 %v4725_v34 }
 0x2c6   : > { %2563 = vmatpush2.bf16.msra.mxu0 %v4727_v35  ;;  %4511 = vmatpush2.bf16.msra.mxu1 %v4727_v35 }
 0x2c7   : > { %2564 = vmatprep.subr.bf16.mxu0 %v4728_v36  ;;  %4496 = vmatprep.subr.bf16.mxu1 %v4728_v36 }
 0x2ca   : > { %2565 = vmatpush2.bf16.msra.mxu0 %v4730_v37  ;;  %4512 = vmatpush2.bf16.msra.mxu1 %v4730_v37 }
 0x2cb   : > { %2566 = vmatprep.subr.bf16.mxu0 %v4731_v38  ;;  %4497 = vmatprep.subr.bf16.mxu1 %v4731_v38 }
 0x2ce   : > { %2567 = vmatpush2.bf16.msra.mxu0 %v4733_v39  ;;  %4513 = vmatpush2.bf16.msra.mxu1 %v4733_v39 }
 0x2cf   : > { %2568 = vmatprep.subr.bf16.mxu0 %v4734_v40  ;;  %4498 = vmatprep.subr.bf16.mxu1 %v4734_v40 }
 0x2d2   : > { %2569 = vmatpush2.bf16.msra.mxu0 %v4736_v41  ;;  %4514 = vmatpush2.bf16.msra.mxu1 %v4736_v41 }
 0x2d3   : > { %2570 = vmatprep.subr.bf16.mxu0 %v4737_v42  ;;  %4499 = vmatprep.subr.bf16.mxu1 %v4737_v42 }
 0x2d6   : > { %2571 = vmatpush2.bf16.msra.mxu0 %v4739_v43  ;;  %4515 = vmatpush2.bf16.msra.mxu1 %v4739_v43 }
 0x2d7   : > { %2572 = vmatprep.subr.bf16.mxu0 %v4740_v44  ;;  %4500 = vmatprep.subr.bf16.mxu1 %v4740_v44 }
 0x2da   : > { %2573 = vmatpush2.bf16.msra.mxu0 %v4742_v12  ;;  %4516 = vmatpush2.bf16.msra.mxu1 %v4742_v12 }
 0x2db   : > { %2574 = vmatprep.subr.bf16.mxu0 %v4743_v13  ;;  %4501 = vmatprep.subr.bf16.mxu1 %v4743_v13 }
 0x2de   : > { %2575 = vmatpush2.bf16.msra.mxu0 %v4745_v10  ;;  %4517 = vmatpush2.bf16.msra.mxu1 %v4745_v10 }
 0x2df   : > { %2576 = vmatprep.subr.bf16.mxu0 %v4746_v8  ;;  %4502 = vmatprep.subr.bf16.mxu1 %v4746_v8 }
 0x2e2   : > { %2577 = vmatpush2.bf16.msra.mxu0 %v4748_v6  ;;  %4518 = vmatpush2.bf16.msra.mxu1 %v4748_v6 }
 0x2e5   : > { %2579 = vmatmul.mubr.bf16.vlgmr.msra.gmra.mxu0 %v4749_v7  ;;  %2619 = vmatmul.mubr.bf16.vlgmr.msra.gmra.mxu1 %v4752_v4 }
 0x2e6   : > { %2588 = vmatprep.mubr.bf16.mxu0 %v4755_v5  ;;  %2628 = vmatprep.mubr.bf16.mxu1 %v4757_v9 }
 0x2ed   : > { %2589 = vmatmul.mubr.bf16.gmra.mxu0 %v4759_v2  ;;  %2629 = vmatmul.mubr.bf16.gmra.mxu1 %v4760_v3 }
 0x2ee   : > { %2598 = vmatprep.mubr.bf16.mxu0 %v4761_v11  ;;  %2638 = vmatprep.mubr.bf16.mxu1 %v4763_v14 }
 0x2f5   : > { %2599 = vmatmul.mubr.bf16.gmra.mxu0 %v4765_v0  ;;  %2639 = vmatmul.mubr.bf16.gmra.mxu1 %v4766_v1 }
 0x2f6   : > { %2608 = vmatprep.mubr.bf16.mxu0 %v4767_v15  ;;  %2648 = vmatprep.mubr.bf16.mxu1 %v4769_v45 }
 0x2fd   : > { %2609 = vmatmul.mubr.bf16.gmra.mxu0 %v4771_v46  ;;  %2649 = vmatmul.mubr.bf16.gmra.mxu1 %v4772_v47 }
 0x3a5   : > { %v2580_v55 = vpop.f32.mrf.mxu0  ;;  %v2620_v56 = vpop.f32.mrf.mxu1 }
 0x3a6   : > { %v2581_v57 = vadd.f32 %v2580_v55, %v5251_v53  ;;  %v2621_v58 = vadd.f32 %v2620_v56, %v5251_v53 }
 0x3a7   : > { %v2582_v59 = vpop.f32.mrf.mxu0  ;;  %v2622_v60 = vpop.f32.mrf.mxu1 }
 0x3a8   : > { %v2583_v61 = vadd.f32 %v2582_v59, %v5253_v54  ;;  %v2623_v62 = vadd.f32 %v2622_v60, %v5253_v54  ;;  %v2659_v63 = vmax.f32 %v2581_v57, 0.0  ;;  %v2675_v16 = vmax.f32 %v2621_v58, 0.0 }
 0x3a9   : > { %v2584_v17 = vpop.f32.mrf.mxu0  ;;  %v2624_v18 = vpop.f32.mrf.mxu1 }
 0x3aa   : > { %v2660_v19 = vmax.f32 %v2583_v61, 0.0  ;;  %v2676_v20 = vmax.f32 %v2623_v62, 0.0  ;;  %v2585_v21 = vadd.f32 %v2584_v17, %v5251_v53  ;;  %v2625_v22 = vadd.f32 %v2624_v18, %v5251_v53 }
 0x3ab   : > { %v2586_v23 = vpop.f32.mrf.mxu0  ;;  %v2626_v24 = vpop.f32.mrf.mxu1 }
 0x3ac   : > { %v4118_v25 = vpack.c.bf16 %v2660_v19, %v2659_v63  ;;  %v4126_v26 = vpack.c.bf16 %v2676_v20, %v2675_v16  ;;  %v2661_v27 = vmax.f32 %v2585_v21, 0.0  ;;  %v2677_v28 = vmax.f32 %v2625_v22, 0.0 }
 0x3ad   : > { %v2587_v29 = vadd.f32 %v2586_v23, %v5253_v54  ;;  %v2627_v30 = vadd.f32 %v2626_v24, %v5253_v54  ;;  %v2590_v31 = vpop.f32.mrf.mxu0  ;;  %v2630_v32 = vpop.f32.mrf.mxu1 }
 0x3ae   : > { %2793 = vst [vmem:[%s5266_s23] sm:$0xff] %v4118_v25  ;;  %2801 = vst [vmem:[%s5266_s23 + $0x40] sm:$0xff] %v4126_v26  ;;  %v5270_v33 = vpack.c.bf16 %v2661_v27, %v2659_v63  ;;  %v5272_v34 = vpack.c.bf16 %v2677_v28, %v2675_v16  ;;  %v2591_v35 = vadd.f32 %v2590_v31, %v5251_v53 }
 0x3af   : > { %v2631_v36 = vadd.f32 %v2630_v32, %v5251_v53  ;;  %v2662_v37 = vmax.f32 %v2587_v29, 0.0  ;;  %v2678_v38 = vmax.f32 %v2627_v30, 0.0  ;;  %v2592_v39 = vpop.f32.mrf.mxu0  ;;  %v2632_v40 = vpop.f32.mrf.mxu1 }
 0x3b0   : > { %v2663_v41 = vmax.f32 %v2591_v35, 0.0  ;;  %v2593_v43 = vadd.f32 %v2592_v39, %v5253_v54  ;;  %v2633_v44 = vadd.f32 %v2632_v40, %v5253_v54 }
 0x3b1   : > { %v2679_v42 = vmax.f32 %v2631_v36, 0.0  ;;  %v5278_v12 = vpack.c.bf16 %v2662_v37, %v2660_v19  ;;  %v4119_v13 = vpack.c.bf16 %v2662_v37, %v2661_v27  ;;  %v5280_v10 = vpack.c.bf16 %v2678_v38, %v2676_v20  ;;  %v2594_v6 = vpop.f32.mrf.mxu0  ;;  %v2634_v7 = vpop.f32.mrf.mxu1 }
 0x3b2   : > { %v4127_v8 = vpack.c.bf16 %v2678_v38, %v2677_v28  ;;  %v2664_v4 = vmax.f32 %v2593_v43, 0.0  ;;  %v2680_v5 = vmax.f32 %v2633_v44, 0.0  ;;  %v2595_v9 = vadd.f32 %v2594_v6, %v5251_v53 }
 0x3b3   : > { %v2635_v2 = vadd.f32 %v2634_v7, %v5251_v53  ;;  %2794 = vst [vmem:[%s5266_s23 + $0x8] sm:$0xff] %v4119_v13  ;;  %v2596_v3 = vpop.f32.mrf.mxu0  ;;  %v2636_v11 = vpop.f32.mrf.mxu1 }
 0x3b4   : > { %2802 = vst [vmem:[%s5266_s23 + $0x48] sm:$0xff] %v4127_v8  ;;  %v4120_v14 = vpack.c.bf16 %v2664_v4, %v2663_v41  ;;  %v4128_v0 = vpack.c.bf16 %v2680_v5, %v2679_v42  ;;  %v2665_v1 = vmax.f32 %v2595_v9, 0.0  ;;  %v2597_v45 = vadd.f32 %v2596_v3, %v5253_v54 }
 0x3b5   : > { %v2681_v15 = vmax.f32 %v2635_v2, 0.0  ;;  %v2637_v46 = vadd.f32 %v2636_v11, %v5253_v54  ;;  %v2600_v47 = vpop.f32.mrf.mxu0  ;;  %v2640_v48 = vpop.f32.mrf.mxu1 }
 0x3b6   : > { %2795 = vst [vmem:[%s5266_s23 + $0x10] sm:$0xff] %v4120_v14  ;;  %2803 = vst [vmem:[%s5266_s23 + $0x50] sm:$0xff] %v4128_v0  ;;  %v5290_v50 = vpack.c.bf16 %v2665_v1, %v2663_v41  ;;  %v2601_v52 = vadd.f32 %v2600_v47, %v5251_v53  ;;  %v2641_v55 = vadd.f32 %v2640_v48, %v5251_v53  ;;  %v2666_v56 = vmax.f32 %v2597_v45, 0.0 }
 0x3b7   : > { %v5292_v51 = vpack.c.bf16 %v2681_v15, %v2679_v42  ;;  %v2682_v57 = vmax.f32 %v2637_v46, 0.0  ;;  %v2602_v58 = vpop.f32.mrf.mxu0  ;;  %v2642_v59 = vpop.f32.mrf.mxu1 }
 0x3b8   : > { %v2667_v60 = vmax.f32 %v2601_v52, 0.0  ;;  %v2683_v61 = vmax.f32 %v2641_v55, 0.0  ;;  %v2603_v62 = vadd.f32 %v2602_v58, %v5253_v54  ;;  %v2643_v63 = vadd.f32 %v2642_v59, %v5253_v54 }
 0x3b9   : > { %v5298_v16 = vpack.c.bf16 %v2666_v56, %v2664_v4  ;;  %v4121_v17 = vpack.c.bf16 %v2666_v56, %v2665_v1  ;;  %v5300_v18 = vpack.c.bf16 %v2682_v57, %v2680_v5  ;;  %v4129_v19 = vpack.c.bf16 %v2682_v57, %v2681_v15  ;;  %v2604_v20 = vpop.f32.mrf.mxu0  ;;  %v2644_v21 = vpop.f32.mrf.mxu1 }
 0x3ba   : > { %v2668_v22 = vmax.f32 %v2603_v62, 0.0  ;;  %v2684_v23 = vmax.f32 %v2643_v63, 0.0  ;;  %v2605_v24 = vadd.f32 %v2604_v20, %v5251_v53  ;;  %v2645_v25 = vadd.f32 %v2644_v21, %v5251_v53 }
 0x3bb   : > { %2796 = vst [vmem:[%s5266_s23 + $0x18] sm:$0xff] %v4121_v17  ;;  %2804 = vst [vmem:[%s5266_s23 + $0x58] sm:$0xff] %v4129_v19  ;;  %v2606_v26 = vpop.f32.mrf.mxu0  ;;  %v2646_v27 = vpop.f32.mrf.mxu1 }
 0x3bc   : > { %v4122_v28 = vpack.c.bf16 %v2668_v22, %v2667_v60  ;;  %v4130_v29 = vpack.c.bf16 %v2684_v23, %v2683_v61  ;;  %v2669_v30 = vmax.f32 %v2605_v24, 0.0  ;;  %v2685_v31 = vmax.f32 %v2645_v25, 0.0 }
 0x3bd   : > { %v2607_v32 = vadd.f32 %v2606_v26, %v5253_v54  ;;  %v2647_v35 = vadd.f32 %v2646_v27, %v5253_v54  ;;  %v2610_v36 = vpop.f32.mrf.mxu0  ;;  %v2650_v37 = vpop.f32.mrf.mxu1 }
 0x3be   : > { %2797 = vst [vmem:[%s5266_s23 + $0x20] sm:$0xff] %v4122_v28  ;;  %2805 = vst [vmem:[%s5266_s23 + $0x60] sm:$0xff] %v4130_v29  ;;  %v5310_v38 = vpack.c.bf16 %v2669_v30, %v2667_v60  ;;  %v5312_v39 = vpack.c.bf16 %v2685_v31, %v2683_v61  ;;  %v2611_v40 = vadd.f32 %v2610_v36, %v5251_v53 }
 0x3bf   : > { %v2651_v41 = vadd.f32 %v2650_v37, %v5251_v53  ;;  %v2670_v42 = vmax.f32 %v2607_v32, 0.0  ;;  %v2686_v43 = vmax.f32 %v2647_v35, 0.0  ;;  %v2612_v44 = vpop.f32.mrf.mxu0  ;;  %v2652_v13 = vpop.f32.mrf.mxu1 }
 0x3c0   : > { %v2671_v8 = vmax.f32 %v2611_v40, 0.0  ;;  %v2613_v7 = vadd.f32 %v2612_v44, %v5253_v54  ;;  %v2653_v4 = vadd.f32 %v2652_v13, %v5253_v54 }
 0x3c1   : > { %v2687_v6 = vmax.f32 %v2651_v41, 0.0  ;;  %v5318_v5 = vpack.c.bf16 %v2670_v42, %v2668_v22  ;;  %v4123_v9 = vpack.c.bf16 %v2670_v42, %v2669_v30  ;;  %v5320_v2 = vpack.c.bf16 %v2686_v43, %v2684_v23  ;;  %v2614_v11 = vpop.f32.mrf.mxu0  ;;  %v2654_v14 = vpop.f32.mrf.mxu1 }
 0x3c2   : > { %v4131_v3 = vpack.c.bf16 %v2686_v43, %v2685_v31  ;;  %v2672_v0 = vmax.f32 %v2613_v7, 0.0  ;;  %v2688_v1 = vmax.f32 %v2653_v4, 0.0  ;;  %v2615_v15 = vadd.f32 %v2614_v11, %v5251_v53 }
 0x3c3   : > { %v2655_v45 = vadd.f32 %v2654_v14, %v5251_v53  ;;  %2798 = vst [vmem:[%s5266_s23 + $0x28] sm:$0xff] %v4123_v9  ;;  %v2616_v46 = vpop.f32.mrf.mxu0  ;;  %v2656_v47 = vpop.f32.mrf.mxu1 }
 0x3c4   : > { %2806 = vst [vmem:[%s5266_s23 + $0x68] sm:$0xff] %v4131_v3  ;;  %v4124_v48 = vpack.c.bf16 %v2672_v0, %v2671_v8  ;;  %v4132_v52 = vpack.c.bf16 %v2688_v1, %v2687_v6  ;;  %v2673_v55 = vmax.f32 %v2615_v15, 0.0  ;;  %v2617_v57 = vadd.f32 %v2616_v46, %v5253_v54 }
 0x3c5   : > { %v2689_v56 = vmax.f32 %v2655_v45, 0.0  ;;  %v2657_v58 = vadd.f32 %v2656_v47, %v5253_v54 }
 0x3c6   : > { %2799 = vst [vmem:[%s5266_s23 + $0x30] sm:$0xff] %v4124_v48  ;;  %2807 = vst [vmem:[%s5266_s23 + $0x70] sm:$0xff] %v4132_v52  ;;  %v5330_v59 = vpack.c.bf16 %v2673_v55, %v2671_v8  ;;  %v2674_v53 = vmax.f32 %v2617_v57, 0.0 }
 0x3c7   : > { %v5332_v60 = vpack.c.bf16 %v2689_v56, %v2687_v6  ;;  %v2690_v61 = vmax.f32 %v2657_v58, 0.0  ;;  %2812 = sbr.rel (%p3948_p12) target bundleno = 1616 (0x650), region = 68 }
 0x3c8   : > { %v5334_v62 = vpack.c.bf16 %v2674_v53, %v2672_v0  ;;  %v4125_v63 = vpack.c.bf16 %v2674_v53, %v2673_v55 }
 0x3c9   : > { %v5336_v17 = vpack.c.bf16 %v2690_v61, %v2688_v1  ;;  %v4133_v19 = vpack.c.bf16 %v2690_v61, %v2689_v56 }
 0x3ca   : > { %2800 = vst [vmem:[%s5266_s23 + $0x38] sm:$0xff] %v4125_v63 }
 0x3cb   : > { %2808 = vst [vmem:[%s5266_s23 + $0x78] sm:$0xff] %v4133_v19 }
 0x3cc   : > { %v4773_v54 = vld [vmem:[%s5940_s4 + $0x78] sm:$0xff]   ;;  %2980 = vmatprep.mubr.bf16.mxu0 %v5278_v12  ;;  %3012 = vmatprep.mubr.bf16.mxu1 %v5280_v10  ;;  %v4775_v21 = vld [vmem:[%s5940_s4 + $0x70] sm:$0xff]   ;;  %v4777_v12 = vld [vmem:[%s5940_s4 + $0x68] sm:$0xff]  }
 0x3cd   : > { %v4774_v20 = vld [vmem:[%s5940_s4 + $0x38] sm:$0xff]   ;;  %4231 = vmatprep.subr.bf16.mxu0 %v4773_v54  ;;  %4519 = vmatprep.subr.bf16.mxu1 %v4773_v54  ;;  %v4776_v22 = vld [vmem:[%s5940_s4 + $0x30] sm:$0xff]   ;;  %v4778_v10 = vld [vmem:[%s5940_s4 + $0x28] sm:$0xff]  }
 0x3ce   : > { %4232 = vmatpush3.bf16.msra.mxu0 %v4774_v20  ;;  %4527 = vmatpush3.bf16.msra.mxu1 %v4774_v20  ;;  %v4779_v23 = vld [vmem:[%s5940_s4 + $0x60] sm:$0xff]   ;;  %v4781_v25 = vld [vmem:[%s5940_s4 + $0x58] sm:$0xff]   ;;  %v4783_v27 = vld [vmem:[%s5940_s4 + $0x50] sm:$0xff]  }
 0x3cf   : > { %4233 = vmatprep.subr.bf16.mxu0 %v4775_v21  ;;  %4520 = vmatprep.subr.bf16.mxu1 %v4775_v21  ;;  %v4780_v24 = vld [vmem:[%s5940_s4 + $0x20] sm:$0xff]   ;;  %v4782_v26 = vld [vmem:[%s5940_s4 + $0x18] sm:$0xff]   ;;  %v4784_v28 = vld [vmem:[%s5940_s4 + $0x10] sm:$0xff]  }
 0x3d0   : > { %v4785_v29 = vld [vmem:[%s5940_s4 + $0x48] sm:$0xff]   ;;  %v4787_v31 = vld [vmem:[%s5940_s4 + $0x40] sm:$0xff]  }
 0x3d1   : > { %v4786_v30 = vld [vmem:[%s5940_s4 + $0x8] sm:$0xff]   ;;  %v4788_v32 = vld [vmem:[%s5940_s4] sm:$0xff]  }
 0x3d2   : > { %4234 = vmatpush3.bf16.msra.mxu0 %v4776_v22  ;;  %4528 = vmatpush3.bf16.msra.mxu1 %v4776_v22 }
 0x3d3   : > { %4235 = vmatprep.subr.bf16.mxu0 %v4777_v12  ;;  %4521 = vmatprep.subr.bf16.mxu1 %v4777_v12 }
 0x3d6   : > { %4236 = vmatpush3.bf16.msra.mxu0 %v4778_v10  ;;  %4529 = vmatpush3.bf16.msra.mxu1 %v4778_v10 }
 0x3d7   : > { %4237 = vmatprep.subr.bf16.mxu0 %v4779_v23  ;;  %4522 = vmatprep.subr.bf16.mxu1 %v4779_v23 }
 0x3da   : > { %4238 = vmatpush3.bf16.msra.mxu0 %v4780_v24  ;;  %4530 = vmatpush3.bf16.msra.mxu1 %v4780_v24 }
 0x3db   : > { %4239 = vmatprep.subr.bf16.mxu0 %v4781_v25  ;;  %4523 = vmatprep.subr.bf16.mxu1 %v4781_v25 }
 0x3de   : > { %4240 = vmatpush3.bf16.msra.mxu0 %v4782_v26  ;;  %4531 = vmatpush3.bf16.msra.mxu1 %v4782_v26 }
 0x3df   : > { %4241 = vmatprep.subr.bf16.mxu0 %v4783_v27  ;;  %4524 = vmatprep.subr.bf16.mxu1 %v4783_v27 }
 0x3e2   : > { %4242 = vmatpush3.bf16.msra.mxu0 %v4784_v28  ;;  %4532 = vmatpush3.bf16.msra.mxu1 %v4784_v28 }
 0x3e3   : > { %4243 = vmatprep.subr.bf16.mxu0 %v4785_v29  ;;  %4525 = vmatprep.subr.bf16.mxu1 %v4785_v29 }
 0x3e6   : > { %4244 = vmatpush3.bf16.msra.mxu0 %v4786_v30  ;;  %4533 = vmatpush3.bf16.msra.mxu1 %v4786_v30 }
 0x3e7   : > { %4245 = vmatprep.subr.bf16.mxu0 %v4787_v31  ;;  %4526 = vmatprep.subr.bf16.mxu1 %v4787_v31 }
 0x3ea   : > { %4246 = vmatpush3.bf16.msra.mxu0 %v4788_v32  ;;  %4534 = vmatpush3.bf16.msra.mxu1 %v4788_v32 }
 0x3ed   : > { %2981 = vmatmul.mubr.bf16.vlgmr.msra.gmra.mxu0 %v5270_v33  ;;  %3013 = vmatmul.mubr.bf16.vlgmr.msra.gmra.mxu1 %v5272_v34 }
 0x3ee   : > { %2988 = vmatprep.mubr.bf16.mxu0 %v5298_v16  ;;  %3020 = vmatprep.mubr.bf16.mxu1 %v5300_v18 }
 0x3f5   : > { %2989 = vmatmul.mubr.bf16.gmra.mxu0 %v5290_v50  ;;  %3021 = vmatmul.mubr.bf16.gmra.mxu1 %v5292_v51  ;;  %v5405_v50 = vstv %s2850_s10 }
 0x3f6   : > { %2996 = vmatprep.mubr.bf16.mxu0 %v5318_v5  ;;  %3028 = vmatprep.mubr.bf16.mxu1 %v5320_v2 }
 0x3fd   : > { %2997 = vmatmul.mubr.bf16.gmra.mxu0 %v5310_v38  ;;  %3029 = vmatmul.mubr.bf16.gmra.mxu1 %v5312_v39 }
 0x3fe   : > { %3004 = vmatprep.mubr.bf16.mxu0 %v5334_v62  ;;  %3036 = vmatprep.mubr.bf16.mxu1 %v5336_v17 }
 0x405   : > { %3005 = vmatmul.mubr.bf16.gmra.mxu0 %v5330_v59  ;;  %3037 = vmatmul.mubr.bf16.gmra.mxu1 %v5332_v60 }
 0x4ad   : > { %v4247_v33 = vpop.f32.mrf.mxu0  ;;  %v4271_v34 = vpop.f32.mrf.mxu1 }
 0x4af   : > { %v4248_v51 = vpop.f32.mrf.mxu0  ;;  %v4272_v16 = vpop.f32.mrf.mxu1 }
 0x4b0   : > { %v4249_v18 = vadd.f32 %v4248_v51, %v4247_v33  ;;  %v4273_v35 = vadd.f32 %v4272_v16, %v4271_v34 }
 0x4b1   : > { %v4250_v36 = vpop.f32.mrf.mxu0  ;;  %v4274_v37 = vpop.f32.mrf.mxu1 }
 0x4b2   : > { %v5408_v38 = vadd.f32 %v4249_v18, %v5405_v50  ;;  %v5411_v39 = vadd.f32 %v4273_v35, %v5405_v50 }
 0x4b3   : > { %v4251_v40 = vpop.f32.mrf.mxu0  ;;  %v4275_v41 = vpop.f32.mrf.mxu1 }
 0x4b4   : > { %v3077_v42 = vand.u32 2147483647, %v5408_v38  ;;  %v4252_v43 = vadd.f32 %v4251_v40, %v4250_v36  ;;  %v4276_v44 = vadd.f32 %v4275_v41, %v4274_v37  ;;  %v3045_v6 = vmax.f32 %v5408_v38, 0.0 }
 0x4b5   : > { %v4253_v13 = vpop.f32.mrf.mxu0  ;;  %v4277_v8 = vpop.f32.mrf.mxu1  ;;  %v5950_v7 = vmax.f32 %v5411_v39, 0.0  ;;  %v3085_v63 = vand.u32 2147483647, %v5411_v39 }
 0x4b6   : > { %v3093_v4 = vsub.f32 0.0, %v3077_v42  ;;  %v5417_v5 = vadd.f32 %v4252_v43, %v5405_v50  ;;  %v5422_v3 = vsub.f32 %v3045_v6, %v5408_v38  ;;  %v5431_v15 = vadd.f32 %v4276_v44, %v5405_v50 }
 0x4b7   : > { %v4254_v9 = vpop.f32.mrf.mxu0  ;;  %v4278_v2 = vpop.f32.mrf.mxu1  ;;  %v5427_v11 = vsub.f32 %v5950_v7, %v5411_v39  ;;  %v3101_v31 = vsub.f32 0.0, %v3085_v63 }
 0x4b8   : > { %v3109_v14 = vmul.f32 1.442695, %v3093_v4  ;;  %v3078_v0 = vand.u32 2147483647, %v5417_v5  ;;  %v4255_v1 = vadd.f32 %v4254_v9, %v4253_v13  ;;  %v4279_v45 = vadd.f32 %v4278_v2, %v4277_v8 }
 0x4b9   : > { %v4256_v46 = vpop.f32.mrf.mxu0  ;;  %v4280_v47 = vpop.f32.mrf.mxu1  ;;  %v3046_v48 = vmax.f32 %v5417_v5, 0.0  ;;  %v5949_v58 = vmax.f32 %v5431_v15, 0.0  ;;  %v3086_v17 = vand.u32 2147483647, %v5431_v15  ;;  %v3125_v4 = vmul.f32 1.442695, %v3101_v31 }
 0x4ba   : > { %4789 = vpow2.f32 %v3109_v14  ;;  %v3094_v52 = vsub.f32 0.0, %v3078_v0  ;;  %v5435_v55 = vadd.f32 %v4255_v1, %v5405_v50  ;;  %v5447_v19 = vadd.f32 %v4279_v45, %v5405_v50 }
 0x4bb   : > { %v4257_v56 = vpop.f32.mrf.mxu0  ;;  %v4281_v57 = vpop.f32.mrf.mxu1  ;;  %v5441_v59 = vsub.f32 %v3046_v48, %v5417_v5  ;;  %v5462_v26 = vsub.f32 %v5949_v58, %v5431_v15  ;;  %v3102_v32 = vsub.f32 0.0, %v3086_v17 }
 0x4bc   : > { %v3111_v60 = vmul.f32 1.442695, %v3094_v52  ;;  %v3079_v53 = vand.u32 2147483647, %v5435_v55  ;;  %v4258_v61 = vadd.f32 %v4257_v56, %v4256_v46  ;;  %v4282_v62 = vadd.f32 %v4281_v57, %v4280_v47 }
 0x4bd   : > { %v4259_v54 = vpop.f32.mrf.mxu0  ;;  %v4283_v20 = vpop.f32.mrf.mxu1  ;;  %v3047_v21 = vmax.f32 %v5435_v55, 0.0  ;;  %v5948_v24 = vmax.f32 %v5447_v19, 0.0  ;;  %v3087_v36 = vand.u32 2147483647, %v5447_v19  ;;  %v3127_v52 = vmul.f32 1.442695, %v3102_v32 }
 0x4be   : > { %v3095_v22 = vsub.f32 0.0, %v3079_v53  ;;  %v5451_v12 = vadd.f32 %v4258_v61, %v5405_v50  ;;  %4791 = vpow2.f32 %v3111_v60  ;;  %v5466_v29 = vadd.f32 %v4282_v62, %v5405_v50 }
 0x4bf   : > { %v4260_v10 = vpop.f32.mrf.mxu0  ;;  %v4284_v23 = vpop.f32.mrf.mxu1  ;;  %v5457_v25 = vsub.f32 %v3047_v21, %v5435_v55  ;;  %v5482_v43 = vsub.f32 %v5948_v24, %v5447_v19  ;;  %v3103_v56 = vsub.f32 0.0, %v3087_v36 }
 0x4c0   : > { %v3113_v27 = vmul.f32 1.442695, %v3095_v22  ;;  %v3080_v28 = vand.u32 2147483647, %v5451_v12  ;;  %v4261_v30 = vadd.f32 %v4260_v10, %v4259_v54  ;;  %v3048_v51 = vmax.f32 %v5451_v12, 0.0 }
 0x4c1   : > { %v4262_v33 = vpop.f32.mrf.mxu0  ;;  %v4286_v34 = vpop.f32.mrf.mxu1  ;;  %v5947_v35 = vmax.f32 %v5466_v29, 0.0  ;;  %v4285_v37 = vadd.f32 %v4284_v23, %v4283_v20  ;;  %v3088_v20 = vand.u32 2147483647, %v5466_v29  ;;  %v3129_v31 = vmul.f32 1.442695, %v3103_v56 }
 0x4c2   : > { %4793 = vpow2.f32 %v3113_v27  ;;  %v3096_v16 = vsub.f32 0.0, %v3080_v28  ;;  %v5470_v18 = vadd.f32 %v4261_v30, %v5405_v50  ;;  %v5477_v42 = vsub.f32 %v3048_v51, %v5451_v12 }
 0x4c3   : > { %v4263_v40 = vpop.f32.mrf.mxu0  ;;  %v4287_v41 = vpop.f32.mrf.mxu1  ;;  %v5492_v46 = vsub.f32 %v5947_v35, %v5466_v29  ;;  %v5497_v57 = vadd.f32 %v4285_v37, %v5405_v50 }
 0x4c4   : > { %v3115_v44 = vmul.f32 1.442695, %v3096_v16  ;;  %v3081_v13 = vand.u32 2147483647, %v5470_v18  ;;  %v4264_v8 = vadd.f32 %v4263_v40, %v4262_v33  ;;  %v4288_v9 = vadd.f32 %v4287_v41, %v4286_v34 }
 0x4c5   : > { %v4265_v2 = vpop.f32.mrf.mxu0  ;;  %v4289_v14 = vpop.f32.mrf.mxu1  ;;  %v3049_v0 = vmax.f32 %v5470_v18, 0.0  ;;  %v3089_v32 = vand.u32 2147483647, %v5497_v57 }
 0x4c6   : > { %4795 = vpow2.f32 %v3115_v44  ;;  %v3097_v1 = vsub.f32 0.0, %v3081_v13  ;;  %v5487_v45 = vadd.f32 %v4264_v8, %v5405_v50  ;;  %v5507_v22 = vadd.f32 %v4288_v9, %v5405_v50 }
 0x4c7   : > { %v5494_v47 = vpop.eup %4789  ;;  %v4266_v60 = vpop.f32.mrf.mxu0  ;;  %v5502_v61 = vsub.f32 %v3049_v0, %v5470_v18  ;;  %4797 = vpow2.f32 %v3125_v4  ;;  %v5946_v44 = vmax.f32 %v5497_v57, 0.0  ;;  %v3104_v13 = vsub.f32 0.0, %v3088_v20 }
 0x4c8   : > { %v4290_v53 = vpop.f32.mrf.mxu1  ;;  %v3117_v62 = vmul.f32 1.442695, %v3097_v1  ;;  %v3082_v63 = vand.u32 2147483647, %v5487_v45  ;;  %v4267_v17 = vadd.f32 %v4266_v60, %v4265_v2  ;;  %v3141_v27 = vadd.f32 1.0, %v5494_v47 }
 0x4c9   : > { %v4291_v54 = vadd.f32 %v4290_v53, %v4289_v14  ;;  %v4268_v10 = vpop.f32.mrf.mxu0  ;;  %v3090_v8 = vand.u32 2147483647, %v5507_v22  ;;  %v3105_v1 = vsub.f32 0.0, %v3089_v32 }
 0x4ca   : > { %v4292_v23 = vpop.f32.mrf.mxu1  ;;  %4799 = vpow2.f32 %v3117_v62  ;;  %v3098_v28 = vsub.f32 0.0, %v3082_v63  ;;  %v5511_v30 = vadd.f32 %v4267_v17, %v5405_v50  ;;  %v5536_v63 = vsub.f32 %v5946_v44, %v5497_v57 }
 0x4cb   : > { %4801 = vpow2.f32 %v3127_v52  ;;  %v5515_v33 = vadd.f32 %v4291_v54, %v5405_v50  ;;  %v4269_v34 = vpop.f32.mrf.mxu0  ;;  %v5517_v36 = vpop.eup %4791  ;;  %v3131_v17 = vmul.f32 1.442695, %v3104_v13  ;;  %v3106_v54 = vsub.f32 0.0, %v3090_v8 }
 0x4cc   : > { %v4293_v16 = vpop.f32.mrf.mxu1  ;;  %v3119_v37 = vmul.f32 1.442695, %v3098_v28  ;;  %v3083_v40 = vand.u32 2147483647, %v5511_v30  ;;  %v4270_v41 = vadd.f32 %v4269_v34, %v4268_v10  ;;  %4803 = vlog2.f32 %v3141_v27 }
 0x4cd   : > { %v4294_v4 = vadd.f32 %v4293_v16, %v4292_v23  ;;  %v3091_v52 = vand.u32 2147483647, %v5515_v33  ;;  %v3150_v60 = vadd.f32 1.0, %v5517_v36  ;;  %v3133_v28 = vmul.f32 1.442695, %v3105_v1 }
 0x4ce   : > { %4805 = vpow2.f32 %v3119_v37  ;;  %v3099_v9 = vsub.f32 0.0, %v3083_v40  ;;  %v5523_v2 = vadd.f32 %v4270_v41, %v5405_v50  ;;  %v3135_v34 = vmul.f32 1.442695, %v3106_v54 }
 0x4cf   : > { %v5525_v14 = vpop.eup %4793  ;;  %v5529_v56 = vadd.f32 %v4294_v4, %v5405_v50  ;;  %4807 = vpow2.f32 %v3129_v31  ;;  %v3144_v50 = vmul.f32 -0.5, %v5494_v47  ;;  %v3107_v31 = vsub.f32 0.0, %v3091_v52 }
 0x4d0   : > { %v3121_v53 = vmul.f32 1.442695, %v3099_v9  ;;  %v3084_v62 = vand.u32 2147483647, %v5523_v2  ;;  %4809 = vlog2.f32 %v3150_v60  ;;  %v3159_v23 = vadd.f32 1.0, %v5525_v14 }
 0x4d1   : > { %v3092_v20 = vand.u32 2147483647, %v5529_v56  ;;  %v3145_v41 = vadd.f32 1.0, %v3144_v50  ;;  %v3153_v13 = vmul.f32 -0.5, %v5517_v36  ;;  %v3137_v4 = vmul.f32 1.442695, %v3107_v31 }
 0x4d2   : > { %4811 = vpow2.f32 %v3121_v53  ;;  %v3100_v10 = vsub.f32 0.0, %v3084_v62  ;;  %v3147_v9 = vand.u32 2147483647, %v5494_v47  ;;  %v3162_v52 = vmul.f32 -0.5, %v5525_v14 }
 0x4d3   : > { %v5541_v27 = vpop.eup %4795  ;;  %4813 = vlog2.f32 %v3159_v23  ;;  %v3108_v16 = vsub.f32 0.0, %v3092_v20  ;;  %v3156_v62 = vand.u32 2147483647, %v5517_v36  ;;  %v3146_v54 = vmul.f32 %v5494_v47, %v3145_v41 }
 0x4d4   : > { %v3123_v32 = vmul.f32 1.442695, %v3100_v10  ;;  %4815 = vpow2.f32 %v3131_v17  ;;  %v3168_v37 = vadd.f32 1.0, %v5541_v27  ;;  %v5544_v40 = vpop.eup %4797  ;;  %v3154_v20 = vadd.f32 1.0, %v3153_v13 }
 0x4d5   : > { %v3139_v53 = vmul.f32 1.442695, %v3108_v16  ;;  %vm3148_vm0 = vcmp.lt.f32.partialorder %v3147_v9, 0.0004427343  ;;  %v3171_v23 = vmul.f32 -0.5, %v5541_v27 }
 0x4d6   : > { %4817 = vpow2.f32 %v3123_v32  ;;  %v3165_v31 = vand.u32 2147483647, %v5525_v14  ;;  %vm5566_vm1 = vcmp.lt.f32.partialorder %v3156_v62, 0.0004427343  ;;  %v3174_v9 = vand.u32 2147483647, %v5541_v27 }
 0x4d7   : > { %v5547_v8 = vpop.eup %4799  ;;  %4819 = vpow2.f32 %v3133_v28  ;;  %v3163_v28 = vadd.f32 1.0, %v3162_v52 }
 0x4d8   : > { %v5550_v1 = vpop.eup %4801  ;;  %4821 = vlog2.f32 %v3168_v37  ;;  %v3177_v60 = vadd.f32 1.0, %v5547_v8  ;;  %vm5581_vm2 = vcmp.lt.f32.partialorder %v3165_v31, 0.0004427343  ;;  %v3183_v31 = vand.u32 2147483647, %v5547_v8 }
 0x4d9   : > { %4823 = vpow2.f32 %v3135_v34  ;;  %v4804_v17 = vpop.eup %4803  ;;  %v3213_v34 = vadd.f32 1.0, %v5544_v40  ;;  %v3222_v62 = vadd.f32 1.0, %v5550_v1  ;;  %v3164_v38 = vmul.f32 %v5525_v14, %v3163_v28 }
 0x4da   : > { %4825 = vlog2.f32 %v3177_v60  ;;  %v3143_v50 = vmul.f32 0.6931472, %v4804_v17  ;;  %v3180_v17 = vmul.f32 -0.5, %v5547_v8  ;;  %vm5602_vm3 = vcmp.lt.f32.partialorder %v3174_v9, 0.0004427343 }
 0x4db   : > { %v5556_v10 = vpop.eup %4805  ;;  %4827 = vpow2.f32 %v3137_v4  ;;  %v3155_v4 = vmul.f32 %v5517_v36, %v3154_v20  ;;  %vm5623_vm4 = vcmp.lt.f32.partialorder %v3183_v31, 0.0004427343  ;;  %v3225_v44 = vmul.f32 -0.5, %v5550_v1 }
 0x4dc   : > { %v3186_v32 = vadd.f32 1.0, %v5556_v10  ;;  %v5562_v16 = vpop.eup %4807  ;;  %4829 = vpow2.f32 %v3139_v53  ;;  %v5564_v47 = vsel %vm3148_vm0, %v3146_v54, %v3143_v50  ;;  %v3172_v53 = vadd.f32 1.0, %v3171_v23 }
 0x4dd   : > { %v4810_v41 = vpop.eup %4809  ;;  %v3301_v13 = vadd.f32 %v5564_v47, %v3045_v6  ;;  %v3050_v50 = vmax.f32 %v5487_v45, 0.0  ;;  %v3051_v23 = vmax.f32 %v5511_v30, 0.0  ;;  %v3234_v24 = vmul.f32 -0.5, %v5562_v16 }
 0x4de   : > { %4831 = vlog2.f32 %v3186_v32  ;;  %v3152_v60 = vmul.f32 0.6931472, %v4810_v41  ;;  %v3231_v32 = vadd.f32 1.0, %v5562_v16  ;;  %v3173_v37 = vmul.f32 %v5541_v27, %v3172_v53 }
 0x4df   : > { %v5575_v52 = vpop.eup %4811  ;;  %3416 = vrot.lane.b32.xlu0 %v3301_v13, %s4997_s0  ;;  %4833 = vlog2.f32 %v3213_v34  ;;  %v3052_v53 = vmax.f32 %v5523_v2, 0.0  ;;  %v3235_v7 = vadd.f32 1.0, %v3234_v24  ;;  %v3237_v18 = vand.u32 2147483647, %v5562_v16 }
 0x4e0   : > { %v3195_v36 = vadd.f32 1.0, %v5575_v52  ;;  %v4814_v54 = vpop.eup %4813  ;;  %v5588_v20 = vsel %vm5566_vm1, %v3155_v4, %v3152_v60  ;;  %v3181_v4 = vadd.f32 1.0, %v3180_v17  ;;  %v3216_v17 = vmul.f32 -0.5, %v5544_v40 }
 0x4e1   : > { %v5593_v41 = vpop.eup %4815  ;;  %v3302_v14 = vadd.f32 %v5588_v20, %v3046_v48  ;;  %v3161_v28 = vmul.f32 0.6931472, %v4814_v54  ;;  %v3189_v48 = vmul.f32 -0.5, %v5556_v10  ;;  %vm5686_vm10 = vcmp.lt.f32.partialorder %v3237_v18, 0.0004427343 }
 0x4e2   : > { %4835 = vlog2.f32 %v3195_v36  ;;  %v3182_v55 = vmul.f32 %v5547_v8, %v3181_v4  ;;  %v3217_v8 = vadd.f32 1.0, %v3216_v17 }
 0x4e3   : > { %v5599_v34 = vpop.eup %4817  ;;  %4837 = vlog2.f32 %v3222_v62  ;;  %3418 = vrot.lane.b32.xlu0 %v3302_v14, %s4997_s0  ;;  %v5611_v5 = vsel %vm5581_vm2, %v3164_v38, %v3161_v28  ;;  %v3219_v62 = vand.u32 2147483647, %v5544_v40  ;;  %v3198_v28 = vmul.f32 -0.5, %v5575_v52 }
 0x4e4   : > { %v5606_v60 = vpop.eup %4819  ;;  %v3204_v36 = vadd.f32 1.0, %v5599_v34  ;;  %4839 = vlog2.f32 %v3231_v32  ;;  %v3303_v9 = vadd.f32 %v5611_v5, %v3047_v21  ;;  %v3240_v32 = vadd.f32 1.0, %v5593_v41 }
 0x4e5   : > { %v4822_v27 = vpop.eup %4821  ;;  %v3192_v21 = vand.u32 2147483647, %v5556_v10  ;;  %vm5642_vm5 = vcmp.lt.f32.partialorder %v3219_v62, 0.0004427343  ;;  %v3207_v13 = vmul.f32 -0.5, %v5599_v34  ;;  %v3249_v12 = vadd.f32 1.0, %v5606_v60 }
 0x4e6   : > { %v5621_v54 = vpop.eup %4823  ;;  %v3170_v38 = vmul.f32 0.6931472, %v4822_v27  ;;  %4841 = vlog2.f32 %v3204_v36  ;;  %3420 = vrot.lane.b32.xlu1 %v3303_v9, %s4997_s0  ;;  %v3190_v27 = vadd.f32 1.0, %v3189_v48  ;;  %v3228_v48 = vand.u32 2147483647, %v5550_v1 }
 0x4e7   : > { %v4826_v14 = vpop.eup %4825  ;;  %4843 = vlog2.f32 %v3240_v32  ;;  %v3199_v62 = vadd.f32 1.0, %v3198_v28  ;;  %v3226_v32 = vadd.f32 1.0, %v3225_v44  ;;  %vm3193_vm6 = vcmp.lt.f32.partialorder %v3192_v21, 0.0004427343 }
 0x4e8   : > { %v5633_v35 = vpop.eup %4827  ;;  %v5637_v31 = vsel %vm5602_vm3, %v3173_v37, %v3170_v38  ;;  %v3179_v36 = vmul.f32 0.6931472, %v4826_v14  ;;  %v3201_v38 = vand.u32 2147483647, %v5575_v52  ;;  %v3191_v14 = vmul.f32 %v5556_v10, %v3190_v27 }
 0x4e9   : > { %v3304_v9 = vadd.f32 %v5637_v31, %v3048_v51  ;;  %v5647_v58 = vpop.eup %4829  ;;  %4845 = vlog2.f32 %v3249_v12  ;;  %v3208_v28 = vadd.f32 1.0, %v3207_v13  ;;  %vm5668_vm7 = vcmp.lt.f32.partialorder %v3228_v48, 0.0004427343 }
 0x4ea   : > { %v5651_v37 = vsel %vm5623_vm4, %v3182_v55, %v3179_v36  ;;  %v3210_v36 = vand.u32 2147483647, %v5599_v34  ;;  %v3243_v10 = vmul.f32 -0.5, %v5593_v41  ;;  %v3258_v21 = vadd.f32 1.0, %v5621_v54 }
 0x4eb   : > { %v4832_v51 = vpop.eup %4831  ;;  %3422 = vrot.lane.b32.xlu1 %v3304_v9, %s4997_s0  ;;  %v3305_v17 = vadd.f32 %v5651_v37, %v3049_v0  ;;  %v3218_v9 = vmul.f32 %v5544_v40, %v3217_v8  ;;  %v3200_v24 = vmul.f32 %v5575_v52, %v3199_v62  ;;  %vm3202_vm8 = vcmp.lt.f32.partialorder %v3201_v38, 0.0004427343 }
 0x4ec   : > { %v3188_v6 = vmul.f32 0.6931472, %v4832_v51  ;;  %v4834_v55 = vpop.eup %4833  ;;  %v3227_v40 = vmul.f32 %v5550_v1, %v3226_v32  ;;  %4847 = vlog2.f32 %v3258_v21  ;;  %v3267_v51 = vadd.f32 1.0, %v5633_v35 }
 0x4ed   : > { %3424 = vrot.lane.b32.xlu0 %v3305_v17, %s4997_s0  ;;  %v3215_v48 = vmul.f32 0.6931472, %v4834_v55  ;;  %vm5681_vm9 = vcmp.lt.f32.partialorder %v3210_v36, 0.0004427343  ;;  %v3252_v1 = vmul.f32 -0.5, %v5606_v60  ;;  %v3209_v38 = vmul.f32 %v5599_v34, %v3208_v28 }
 0x4ee   : > { %v5666_v0 = vsel %vm3193_vm6, %v3191_v14, %v3188_v6  ;;  %v3236_v14 = vmul.f32 %v5562_v16, %v3235_v7  ;;  %v3244_v32 = vadd.f32 1.0, %v3243_v10  ;;  %4849 = vlog2.f32 %v3267_v51 }
 0x4ef   : > { %v4836_v27 = vpop.eup %4835  ;;  %v3306_v12 = vadd.f32 %v5666_v0, %v3050_v50  ;;  %v3255_v7 = vand.u32 2147483647, %v5606_v60  ;;  %v3276_v16 = vadd.f32 1.0, %v5647_v58  ;;  %v3246_v34 = vand.u32 2147483647, %v5593_v41 }
 0x4f0   : > { %v4838_v8 = vpop.eup %4837  ;;  %v3197_v13 = vmul.f32 0.6931472, %v4836_v27  ;;  %v5701_v27 = vsel %vm5642_vm5, %v3218_v9, %v3215_v48  ;;  %v3253_v10 = vadd.f32 1.0, %v3252_v1  ;;  %v3245_v4 = vmul.f32 %v5593_v41, %v3244_v32 }
 0x4f1   : > { %v4840_v17 = vpop.eup %4839  ;;  %3426 = vrot.lane.b32.xlu1 %v3306_v12, %s4997_s0  ;;  %v3224_v21 = vmul.f32 0.6931472, %v4838_v8  ;;  %4851 = vlog2.f32 %v3276_v16  ;;  %v5708_v8 = vadd.f32 %v5564_v47, %v5422_v3  ;;  %v3270_v9 = vmul.f32 -0.5, %v5633_v35 }
 0x4f2   : > { %v5691_v62 = vsel %vm3202_vm8, %v3200_v24, %v3197_v13  ;;  %v3233_v12 = vmul.f32 0.6931472, %v4840_v17  ;;  %v3261_v24 = vmul.f32 -0.5, %v5621_v54  ;;  %v5716_v48 = vadd.f32 %v5588_v20, %v5441_v59 }
 0x4f3   : > { %v4842_v55 = vpop.eup %4841  ;;  %v3307_v36 = vadd.f32 %v5691_v62, %v3051_v23  ;;  %v5975_v17 = vmax.f32 %v5411_v39, 0.0  ;;  %v3230_v3 = vsel %vm5668_vm7, %v3227_v40, %v3224_v21  ;;  %vm5725_vm11 = vcmp.lt.f32.partialorder %v3255_v7, 0.0004427343 }
 0x4f4   : > { %v3206_v18 = vmul.f32 0.6931472, %v4842_v55  ;;  %v4844_v28 = vpop.eup %4843  ;;  %v3239_v41 = vsel %vm5686_vm10, %v3236_v14, %v3233_v12  ;;  %v5733_v59 = vadd.f32 %v5611_v5, %v5457_v25  ;;  %v5737_v39 = vadd.f32 %v5637_v31, %v5477_v42 }
 0x4f5   : > { %3428 = vrot.lane.b32.xlu0 %v3307_v36, %s4997_s0  ;;  %v3309_v1 = vadd.f32 %v5701_v27, %v5975_v17  ;;  %v3242_v6 = vmul.f32 0.6931472, %v4844_v28  ;;  %v3254_v44 = vmul.f32 %v5606_v60, %v3253_v10  ;;  %v3262_v40 = vadd.f32 1.0, %v3261_v24 }
 0x4f6   : > { %v3212_v13 = vsel %vm5681_vm9, %v3209_v38, %v3206_v18  ;;  %v4846_v20 = vpop.eup %4845  ;;  %v3264_v52 = vand.u32 2147483647, %v5621_v54  ;;  %v3273_v14 = vand.u32 2147483647, %v5633_v35  ;;  %v3271_v32 = vadd.f32 1.0, %v3270_v9 }
 0x4f7   : > { %v3308_v51 = vadd.f32 %v3212_v13, %v3052_v53  ;;  %v3251_v38 = vmul.f32 0.6931472, %v4846_v20  ;;  %v5746_v25 = vadd.f32 %v5651_v37, %v5502_v61  ;;  %v3066_v42 = vsub.f32 %v3050_v50, %v5487_v45 }
 0x4f8   : > { %v5978_v5 = vmax.f32 %v5431_v15, 0.0  ;;  %v5979_v60 = vmax.f32 %v5447_v19, 0.0  ;;  %vm3247_vm12 = vcmp.lt.f32.partialorder %v3246_v34, 0.0004427343  ;;  %v3279_v36 = vmul.f32 -0.5, %v5647_v58 }
 0x4f9   : > { %3430 = vrot.lane.b32.xlu1 %v3308_v51, %s4997_s0  ;;  %3432 = vrot.lane.b32.xlu0 %v3309_v1, %s4997_s0  ;;  %v3248_v21 = vsel %vm3247_vm12, %v3245_v4, %v3242_v6  ;;  %v3257_v7 = vsel %vm5725_vm11, %v3254_v44, %v3251_v38  ;;  %v4848_v16 = vpop.eup %4847  ;;  %v3263_v45 = vmul.f32 %v5621_v54, %v3262_v40  ;;  %vm3265_vm13 = vcmp.lt.f32.partialorder %v3264_v52, 0.0004427343 }
 0x4fa   : > { %v3310_v31 = vadd.f32 %v3230_v3, %v5978_v5  ;;  %v3311_v55 = vadd.f32 %v3239_v41, %v5979_v60  ;;  %v5762_v15 = vadd.f32 %v5666_v0, %v3066_v42  ;;  %v3260_v19 = vmul.f32 0.6931472, %v4848_v16 }
 0x4fb   : > { %v3272_v61 = vmul.f32 %v5633_v35, %v3271_v32  ;;  %vm5765_vm14 = vcmp.lt.f32.partialorder %v3273_v14, 0.0004427343  ;;  %v3067_v37 = vsub.f32 %v3051_v23, %v5511_v30  ;;  %v4850_v18 = vpop.eup %4849  ;;  %v5982_v12 = vmax.f32 %v5466_v29, 0.0 }
 0x4fc   : > { %v5983_v54 = vmax.f32 %v5497_v57, 0.0  ;;  %v3280_v0 = vadd.f32 1.0, %v3279_v36  ;;  %v3068_v35 = vsub.f32 %v3052_v53, %v5523_v2  ;;  %v3266_v10 = vsel %vm3265_vm13, %v3263_v45, %v3260_v19 }
 0x4fd   : > { %3434 = vrot.lane.b32.xlu1 %v3310_v31, %s4997_s0  ;;  %3436 = vrot.lane.b32.xlu0 %v3311_v55, %s4997_s0  ;;  %v3312_v34 = vadd.f32 %v3248_v21, %v5982_v12  ;;  %v3269_v24 = vmul.f32 0.6931472, %v4850_v18  ;;  %v3282_v4 = vand.u32 2147483647, %v5647_v58  ;;  %v5781_v9 = vadd.f32 %v5691_v62, %v3067_v37 }
 0x4fe   : > { %v3313_v28 = vadd.f32 %v3257_v7, %v5983_v54  ;;  %v3058_v29 = vmax.f32 %v5507_v22, 0.0  ;;  %v3059_v57 = vmax.f32 %v5515_v33, 0.0  ;;  %v5787_v30 = vadd.f32 %v3212_v13, %v3068_v35  ;;  %v4852_v23 = vpop.eup %4851 }
 0x4ff   : > { %v3275_v2 = vsel %vm5765_vm14, %v3272_v61, %v3269_v24  ;;  %v5793_v53 = vadd.f32 %v5701_v27, %v5427_v11  ;;  %v5796_v62 = vadd.f32 %v3230_v3, %v5462_v26  ;;  %v3278_v1 = vmul.f32 0.6931472, %v4852_v23 }
 0x500   : > { %v3314_v51 = vadd.f32 %v3266_v10, %v3058_v29  ;;  %v3315_v17 = vadd.f32 %v3275_v2, %v3059_v57  ;;  %v3281_v47 = vmul.f32 %v5647_v58, %v3280_v0  ;;  %vm3283_vm15 = vcmp.lt.f32.partialorder %v3282_v4, 0.0004427343 }
 0x501   : > { %3438 = vrot.lane.b32.xlu1 %v3312_v34, %s4997_s0  ;;  %3440 = vrot.lane.b32.xlu0 %v3313_v28, %s4997_s0  ;;  %v5800_v13 = vadd.f32 %v3239_v41, %v5482_v43  ;;  %v3060_v11 = vmax.f32 %v5529_v56, 0.0  ;;  %v5806_v26 = vadd.f32 %v3248_v21, %v5492_v46  ;;  %v5809_v6 = vadd.f32 %v3257_v7, %v5536_v63 }
 0x502   : > { %v3284_v27 = vsel %vm3283_vm15, %v3281_v47, %v3278_v1  ;;  %v3074_v58 = vsub.f32 %v3058_v29, %v5507_v22  ;;  %v3075_v43 = vsub.f32 %v3059_v57, %v5515_v33  ;;  %v5823_v46 = vstv %s3929_s8  ;;  %s4999_s8 = smov 0.0  }
 0x503   : > { %v3316_v3 = vadd.f32 %v3284_v27, %v3060_v11  ;;  %v3076_v44 = vsub.f32 %v3060_v11, %v5529_v56  ;;  %v3319_v63 = vadd.s32 8, %v5246_v49  ;;  %v3335_v22 = vadd.s32 %v5823_v46, %v5246_v49  ;;  %4544 = sst [smem:[#allocation4]] (%p4562_p7), %s4999_s8 }
 0x504   : > { %v5814_v41 = vadd.f32 %v3266_v10, %v3074_v58  ;;  %v5816_v20 = vadd.f32 %v3275_v2, %v3075_v43  ;;  %v3320_v52 = vadd.s32 16, %v5246_v49  ;;  %v3321_v56 = vadd.s32 24, %v5246_v49  ;;  %s3399_s14 = sld [smem:[#allocation4]] }
 0x505   : > { %3442 = vrot.lane.b32.xlu1 %v3314_v51, %s4997_s0  ;;  %3444 = vrot.lane.b32.xlu0 %v3315_v17, %s4997_s0  ;;  %v5819_v40 = vadd.f32 %v3284_v27, %v3076_v44  ;;  %v3336_v33 = vadd.s32 %v5823_v46, %v3319_v63  ;;  %vm3351_vm0 = vcmp.lt.s32.totalorder %v3335_v22, 200  ;;  %v4998_v42 = vmov 0.0  }
 0x506   : > { %v3337_v38 = vadd.s32 %v5823_v46, %v3320_v52  ;;  %v3966_v5 = vsel %vm3351_vm0, 1.0, %v4998_v42  ;;  %v3322_v31 = vadd.s32 32, %v5246_v49  ;;  %v3338_v36 = vadd.s32 %v5823_v46, %v3321_v56 }
 0x507   : > { %vm3352_vm1 = vcmp.lt.s32.totalorder %v3336_v33, 200  ;;  %v3323_v21 = vadd.s32 40, %v5246_v49  ;;  %vm3496_vm3 = vcmask 7168   ;;  %v3324_v34 = vadd.s32 48, %v5246_v49 }
 0x508   : > { %v3967_v60 = vsel %vm3352_vm1, 1.0, %v4998_v42  ;;  %vm3353_vm2 = vcmp.lt.s32.totalorder %v3337_v38, 200  ;;  %vm3354_vm4 = vcmp.lt.s32.totalorder %v3338_v36, 200  ;;  %v3326_v23 = vadd.s32 64, %v5246_v49 }
 0x509   : > { %3446 = vrot.lane.b32.xlu1 %v3316_v3, %s4997_s0  ;;  %v3968_v19 = vsel %vm3353_vm2, 1.0, %v4998_v42  ;;  %v3340_v37 = vadd.s32 %v5823_v46, %v3323_v21  ;;  %v3969_v28 = vsel %vm3354_vm4, 1.0, %v4998_v42  ;;  %v3341_v57 = vadd.s32 %v5823_v46, %v3324_v34 }
 0x50a   : > { %v3327_v11 = vadd.s32 72, %v5246_v49  ;;  %v3343_v58 = vadd.s32 %v5823_v46, %v3326_v23  ;;  %v3328_v43 = vadd.s32 80, %v5246_v49  ;;  %v3329_v56 = vadd.s32 88, %v5246_v49 }
 0x50b   : > { %vm3356_vm6 = vcmp.lt.s32.totalorder %v3340_v37, 200  ;;  %vm3357_vm7 = vcmp.lt.s32.totalorder %v3341_v57, 200 }
 0x50c   : > { %v3971_v17 = vsel %vm3356_vm6, 1.0, %v4998_v42  ;;  %v3972_v52 = vsel %vm3357_vm7, 1.0, %v4998_v42  ;;  %v3344_v33 = vadd.s32 %v5823_v46, %v3327_v11  ;;  %vm3359_vm9 = vcmp.lt.s32.totalorder %v3343_v58, 200 }
 0x50d   : > { %v3345_v38 = vadd.s32 %v5823_v46, %v3328_v43  ;;  %v3974_v36 = vsel %vm3359_vm9, 1.0, %v4998_v42 }
 0x50e   : > { %vm3360_vm10 = vcmp.lt.s32.totalorder %v3344_v33, 200 }
 0x50f   : > { %vm3361_vm11 = vcmp.lt.s32.totalorder %v3345_v38, 200  ;;  %v3975_v34 = vsel %vm3360_vm10, 1.0, %v4998_v42 }
 0x551   : > { %v3417_v14 = vpop.permute.xlu0 %3416 }
 0x552   : > { %v3464_v32 = vadd.f32 %v3417_v14, %v5708_v8  ;;  %v3339_v8 = vadd.s32 %v5823_v46, %v3322_v31 }
 0x554   : > { %v3480_v7 = vmul.f32 %v3966_v5, %v3464_v32  ;;  %vm3355_vm5 = vcmp.lt.s32.totalorder %v3339_v8, 200  ;;  %v3330_v32 = vadd.s32 96, %v5246_v49 }
 0x555   : > { %v3419_v55 = vpop.permute.xlu0 %3418  ;;  %v3970_v4 = vsel %vm3355_vm5, 1.0, %v4998_v42 }
 0x556   : > { %v3465_v16 = vadd.f32 %v3419_v55, %v5716_v48  ;;  %v3497_v18 = vsel %vm3496_vm3, %v3480_v7, 0.0  ;;  %v3347_v8 = vadd.s32 %v5823_v46, %v3330_v32 }
 0x558   : > { %v3481_v45 = vmul.f32 %v3967_v60, %v3465_v16  ;;  %v3421_v61 = vpop.permute.xlu1 %3420  ;;  %v3346_v16 = vadd.s32 %v5823_v46, %v3329_v56  ;;  %vm3363_vm13 = vcmp.lt.s32.totalorder %v3347_v8, 200 }
 0x559   : > { %v3466_v50 = vadd.f32 %v3421_v61, %v5733_v59  ;;  %v3325_v59 = vadd.s32 56, %v5246_v49 }
 0x55a   : > { %v3498_v12 = vsel %vm3496_vm3, %v3481_v45, 0.0  ;;  %v3331_v45 = vadd.s32 104, %v5246_v49  ;;  %vm3362_vm12 = vcmp.lt.s32.totalorder %v3346_v16, 200 }
 0x55b   : > { %v3499_v54 = vadd.f32 %v3498_v12, %v3497_v18  ;;  %v3482_v48 = vmul.f32 %v3968_v19, %v3466_v50  ;;  %v3332_v50 = vadd.s32 112, %v5246_v49  ;;  %v3977_v23 = vsel %vm3362_vm12, 1.0, %v4998_v42 }
 0x55d   : > { %v3423_v0 = vpop.permute.xlu1 %3422  ;;  %v3500_v35 = vsel %vm3496_vm3, %v3482_v48, 0.0 }
 0x55e   : > { %v3467_v10 = vadd.f32 %v3423_v0, %v5737_v39  ;;  %v3501_v24 = vadd.f32 %v3500_v35, %v3499_v54  ;;  %v3342_v39 = vadd.s32 %v5823_v46, %v3325_v59  ;;  %v3976_v54 = vsel %vm3361_vm11, 1.0, %v4998_v42 }
 0x55f   : > { %v3425_v29 = vpop.permute.xlu0 %3424  ;;  %v3348_v0 = vadd.s32 %v5823_v46, %v3331_v45  ;;  %v3333_v35 = vadd.s32 120, %v5246_v49  ;;  %v3349_v59 = vadd.s32 %v5823_v46, %v3332_v50 }
 0x560   : > { %v3483_v2 = vmul.f32 %v3969_v28, %v3467_v10  ;;  %v3468_v51 = vadd.f32 %v3425_v29, %v5746_v25  ;;  %vm3358_vm8 = vcmp.lt.s32.totalorder %v3342_v39, 200 }
 0x561   : > { %v3973_v55 = vsel %vm3358_vm8, 1.0, %v4998_v42  ;;  %vm3364_vm14 = vcmp.lt.s32.totalorder %v3348_v0, 200  ;;  %vm3365_vm15 = vcmp.lt.s32.totalorder %v3349_v59, 200 }
 0x562   : > { %v3502_v1 = vsel %vm3496_vm3, %v3483_v2, 0.0  ;;  %v3484_v47 = vmul.f32 %v3970_v4, %v3468_v51  ;;  %v3979_v43 = vsel %vm3364_vm14, 1.0, %v4998_v42 }
 0x563   : > { %v3503_v27 = vadd.f32 %v3502_v1, %v3501_v24  ;;  %v3427_v3 = vpop.permute.xlu1 %3426  ;;  %v3350_v1 = vadd.s32 %v5823_v46, %v3333_v35 }
 0x564   : > { %v3504_v44 = vsel %vm3496_vm3, %v3484_v47, 0.0  ;;  %v3469_v25 = vadd.f32 %v3427_v3, %v5762_v15 }
 0x565   : > { %v3505_v63 = vadd.f32 %v3504_v44, %v3503_v27  ;;  %vm3366_vm0 = vcmp.lt.s32.totalorder %v3350_v1, 200 }
 0x566   : > { %v3485_v22 = vmul.f32 %v3971_v17, %v3469_v25  ;;  %v3978_v17 = vsel %vm3363_vm13, 1.0, %v4998_v42  ;;  %v3980_v25 = vsel %vm3365_vm15, 1.0, %v4998_v42  ;;  %v3981_v56 = vsel %vm3366_vm0, 1.0, %v4998_v42 }
 0x567   : > { %v3429_v14 = vpop.permute.xlu0 %3428 }
 0x568   : > { %v3506_v5 = vsel %vm3496_vm3, %v3485_v22, 0.0  ;;  %v3470_v31 = vadd.f32 %v3429_v14, %v5781_v9 }
 0x569   : > { %v3507_v15 = vadd.f32 %v3506_v5, %v3505_v63 }
 0x56a   : > { %v3486_v60 = vmul.f32 %v3972_v52, %v3470_v31 }
 0x56b   : > { %v3431_v21 = vpop.permute.xlu1 %3430  ;;  %v3433_v7 = vpop.permute.xlu0 %3432 }
 0x56c   : > { %v3508_v19 = vsel %vm3496_vm3, %v3486_v60, 0.0  ;;  %v3471_v9 = vadd.f32 %v3431_v21, %v5787_v30  ;;  %v3472_v61 = vadd.f32 %v3433_v7, %v5793_v53 }
 0x56d   : > { %v3509_v37 = vadd.f32 %v3508_v19, %v3507_v15 }
 0x56e   : > { %v3487_v18 = vmul.f32 %v3973_v55, %v3471_v9  ;;  %v3488_v12 = vmul.f32 %v3974_v36, %v3472_v61 }
 0x56f   : > { %v3435_v48 = vpop.permute.xlu1 %3434  ;;  %v3437_v28 = vpop.permute.xlu0 %3436 }
 0x570   : > { %v3510_v30 = vsel %vm3496_vm3, %v3487_v18, 0.0  ;;  %v3473_v53 = vadd.f32 %v3435_v48, %v5796_v62  ;;  %v3474_v10 = vadd.f32 %v3437_v28, %v5800_v13  ;;  %v3512_v4 = vsel %vm3496_vm3, %v3488_v12, 0.0 }
 0x571   : > { %v3511_v24 = vadd.f32 %v3510_v30, %v3509_v37 }
 0x572   : > { %v3489_v29 = vmul.f32 %v3975_v34, %v3473_v53  ;;  %v3490_v57 = vmul.f32 %v3976_v54, %v3474_v10 }
 0x573   : > { %v3513_v2 = vadd.f32 %v3512_v4, %v3511_v24  ;;  %v3439_v51 = vpop.permute.xlu1 %3438  ;;  %v3441_v49 = vpop.permute.xlu0 %3440 }
 0x574   : > { %v3514_v62 = vsel %vm3496_vm3, %v3489_v29, 0.0  ;;  %v3475_v13 = vadd.f32 %v3439_v51, %v5806_v26  ;;  %v3476_v47 = vadd.f32 %v3441_v49, %v5809_v6  ;;  %v3516_v11 = vsel %vm3496_vm3, %v3490_v57, 0.0 }
 0x575   : > { %v3515_v39 = vadd.f32 %v3514_v62, %v3513_v2 }
 0x576   : > { %v3491_v27 = vmul.f32 %v3977_v23, %v3475_v13  ;;  %v3492_v3 = vmul.f32 %v3978_v17, %v3476_v47 }
 0x577   : > { %v3517_v58 = vadd.f32 %v3516_v11, %v3515_v39  ;;  %v3443_v44 = vpop.permute.xlu1 %3442  ;;  %v3445_v63 = vpop.permute.xlu0 %3444 }
 0x578   : > { %v3518_v46 = vsel %vm3496_vm3, %v3491_v27, 0.0  ;;  %v3477_v22 = vadd.f32 %v3443_v44, %v5814_v41  ;;  %v3478_v26 = vadd.f32 %v3445_v63, %v5816_v20  ;;  %v3520_v52 = vsel %vm3496_vm3, %v3492_v3, 0.0 }
 0x579   : > { %v3519_v6 = vadd.f32 %v3518_v46, %v3517_v58 }
 0x57a   : > { %v3493_v33 = vmul.f32 %v3979_v43, %v3477_v22  ;;  %v3494_v14 = vmul.f32 %v3980_v25, %v3478_v26 }
 0x57b   : > { %v3521_v38 = vadd.f32 %v3520_v52, %v3519_v6  ;;  %v3447_v32 = vpop.permute.xlu1 %3446 }
 0x57c   : > { %v3522_v5 = vsel %vm3496_vm3, %v3493_v33, 0.0  ;;  %v3479_v31 = vadd.f32 %v3447_v32, %v5819_v40  ;;  %v3524_v41 = vsel %vm3496_vm3, %v3494_v14, 0.0 }
 0x57d   : > { %v3523_v15 = vadd.f32 %v3522_v5, %v3521_v38 }
 0x57e   : > { %v3495_v60 = vmul.f32 %v3981_v56, %v3479_v31 }
 0x57f   : > { %v3525_v20 = vadd.f32 %v3524_v41, %v3523_v15 }
 0x580   : > { %v3526_v55 = vsel %vm3496_vm3, %v3495_v60, 0.0 }
 0x581   : > { %v3527_v36 = vadd.f32 %v3526_v55, %v3525_v20 }
 0x583   : > { %3528 = vadd.xlane.f32.xlu0 %v3527_v36 }
 0x60c   : > { %v3529_v21 = vpop.xlane.xlu0 %3528 }
 0x60d   : > { %v3530_v42 = vrot.slane %v3529_v21, 4 }
 0x60f   : > { %v3531_v7 = vadd.f32 %v3530_v42, %v3529_v21 }
 0x611   : > { %v3532_v16 = vrot.slane %v3531_v7, 2 }
 0x613   : > { %v3533_v8 = vadd.f32 %v3532_v16, %v3531_v7 }
 0x615   : > { %v3534_v45 = vrot.slane %v3533_v8, 1 }
 0x617   : > { %v3535_v40 = vadd.f32 %v3534_v45, %v3533_v8 }
 0x619   : > { %4535 = vpush %v3535_v40 }
 0x64a   : > { %s4536_s22 = spop %4535 }
 0x64b   : > { %s3537_s12 = sadd.f32 %s4536_s22, %s3399_s14 }
 0x64d   : > { %3539 = sst [smem:[#allocation4]] %s3537_s12  ;;  %s3547_s5 = smul.f32 0.0025, %s3537_s12 }
 0x64f   : > { %4546 = sst [smem:[#allocation11]] (%p4563_p13), %s3547_s5 }
 0x650 PF: > { %s5984_s27 = sadd.s32 4294967295, %s4991_s30   ;;  %s5000_s9 = smov [#allocation11]  }
 0x651   : > { %p4564_p0 = scmp.eq.s32.totalorder %s5984_s27, 3 }
 0x653   : > { %4548 = dma.smem_to_hbm (%p4564_p0), %s5000_s9, 16, %s5942_s6, [#allocation8]  }
 0x654   : > { %4958 = dma.done.wait (%p4564_p0), [#allocation8], 16  }
 0x655   : > { %4960 = vsyncadd (%p4564_p0), [#allocation8], 4294967280 }
 0x656   : > { %3563 = sfence }
 0x657 PF: > { %s22_s30 = sadd.s32 1, %s4991_s30   ;;  %s5985_s23 = smov %s4967_s24 }
 0x658   : > { %p19_p2 = scmp.ge.s32.totalorder %s22_s30, 6   ;;  %s5986_s24 = smov %s4971_s25 }
 0x659   : > { %s5987_s25 = smov %s5122_s21  ;;  %s5988_s26 = smov %s4983_s28 }
 0x65a   : > { %s5989_s27 = smov %s4987_s29  ;;  %s5990_s28 = smov %s5993_s17 }
 0x65b   : > { %s5991_s29 = smov %s5997_s18  ;;  %21 = sbr.rel (!%p19_p2) target bundleno = 10 (0xa), region = 120 }
 0x660   :  { %3569 = vsyncpa [#allocation7], 1 }
 0x661   :  { %3571 = vsyncpa [#allocation7 + $0x1], 1 }
 0x662   :  { %3572 = vsyncpa [#allocation10], 1 }
 0x663   :  { %3574 = vsyncpa [#allocation10 + $0x1], 1 }
 0x664   :  { %3575 = vsyncpa [#allocation8], 1 }
 0x665   :  { %3577 = vsyncpa [#allocation8 + $0x1], 1 }

</bundles_post_ra>
